<compile_context>
chip_gen: v7x
topology: tpu7x:2x2x1
jax: 0.10.0
libtpu: 0.0.40
codegen_flags: <defaults>
</compile_context>

<pallas_src>
import functools

import jax
import jax.numpy as jnp
from jax import lax
from jax.experimental import pallas as pl
from jax.experimental.pallas import tpu as pltpu

LEAK = 0.2        # LeakyReLU negative slope
BN_EPS = 0.8      # nn.BatchNorm2d(out_filters, 0.8) -> eps = 0.8 (reference quirk)
COUT_PAD = 128    # conv output channels padded to lane width (stores stay lane-dense)
HEAD_PAD = 128    # combined head output width (lane-dense)
KSIZE = 3


def _round_up(x, m):
    return ((x + m - 1) // m) * m


def _vmem_limit_bytes():
    """Generation-aware scoped-VMEM limit: v5e/v6e have 128 MiB physical, v7x 64 MiB."""
    try:
        kind = jax.devices()[0].device_kind.lower()
    except Exception:
        kind = ""
    if "v7" in kind:
        return 48 * 1024 * 1024
    if "v5" in kind or "v6" in kind:
        return 96 * 1024 * 1024
    return 48 * 1024 * 1024          # unknown: conservative


_COMPILER_PARAMS = pltpu.CompilerParams(
    dimension_semantics=("parallel",),
    vmem_limit_bytes=_vmem_limit_bytes(),
)


# ---------------------------------------------------------------------------
# Pallas kernels
# ---------------------------------------------------------------------------
def _conv_block_kernel(p_ref, w_ref, bss_ref, o_ref):
    """Fused conv-as-GEMM block: matmul + bias + LeakyReLU + folded eval-mode BN."""
    y = jnp.dot(p_ref[...], w_ref[...], preferred_element_type=jnp.float32)
    bss = bss_ref[...]                                 # (3, 128): bias / scale / shift
    y = y + bss[0:1, :]                                # conv bias
    y = jnp.where(y > 0, y, LEAK * y)                  # LeakyReLU(0.2); Dropout2d eval = id
    o_ref[...] = (y * bss[1:2, :] + bss[2:3, :]).astype(o_ref.dtype)


def _heads_epilogue(logits, n_classes, out_ref):
    """One lane-dense (tm, 128) store: softmax probs in [0,n_classes), sigmoid at col
    n_classes, zeros elsewhere (sliced apart in the wrapper)."""
    col = lax.broadcasted_iota(jnp.int32, logits.shape, 1)
    is_cls = col < n_classes
    # softmax over the class columns only
    l = jnp.where(is_cls, logits, -jnp.inf)
    m = jnp.max(l, axis=-1, keepdims=True)
    e = jnp.exp(l - m)
    sm = e * pl.reciprocal(jnp.sum(e, axis=-1, keepdims=True), approx=True)
    # numerically stable sigmoid (elementwise; only col n_classes is kept)
    ev = jnp.exp(-jnp.abs(logits))
    sg = jnp.where(logits >= 0.0, 1.0 / (1.0 + ev), ev / (1.0 + ev))
    out_ref[...] = jnp.where(is_cls, sm, jnp.where(col == n_classes, sg, 0.0))


def _last_block_heads_kernel(n_classes, p_ref, w_ref, bss_ref, hw_ref, hb_ref, out_ref):
    """Block 4 GEMM + both classifier heads, fused (used when ds_size == 1)."""
    y = jnp.dot(p_ref[...], w_ref[...], preferred_element_type=jnp.float32)
    bss = bss_ref[...]
    y = y + bss[0:1, :]
    y = jnp.where(y > 0, y, LEAK * y)
    feat = y * bss[1:2, :] + bss[2:3, :]               # (tm, 128) == flattened features
    logits = jnp.dot(feat.astype(hw_ref.dtype), hw_ref[...],
                     preferred_element_type=jnp.float32) + hb_ref[...]
    _heads_epilogue(logits, n_classes, out_ref)


def _heads_kernel(n_classes, x_ref, hw_ref, hb_ref, out_ref):
    """Standalone heads (only used when ds_size > 1)."""
    logits = jnp.dot(x_ref[...], hw_ref[...],
                     preferred_element_type=jnp.float32) + hb_ref[...]
    _heads_epilogue(logits, n_classes, out_ref)


# ---------------------------------------------------------------------------
# Wrappers (glue: im2col, padding, pallas_call plumbing)
# ---------------------------------------------------------------------------
def _im2col_nhwc(x, cin, *, stride=2, pad=1):
    """x: [N, H, W, C>=cin] -> patches [N*Ho*Wo, round_up(9*cin, 128)] bf16.
    Only the REAL cin channels are gathered (K-trim); columns padded once to a
    lane-dense K.  Row order (n, ho, wo); column order (kh, kw, c)."""
    N, H, W, _ = x.shape
    x = x[..., :cin]
    k = KSIZE
    Ho = (H + 2 * pad - k) // stride + 1
    Wo = (W + 2 * pad - k) // stride + 1
    xp = jnp.pad(x, ((0, 0), (pad, pad), (pad, pad), (0, 0)))
    cols = []
    for i in range(k):
        for j in range(k):
            cols.append(xp[:, i:i + stride * Ho:stride, j:j + stride * Wo:stride, :])
    patches = jnp.concatenate(cols, axis=-1)           # [N, Ho, Wo, 9*cin]
    K = k * k * cin
    Kp = _round_up(K, 128)
    patches = patches.reshape(N * Ho * Wo, K)
    if Kp != K:
        patches = jnp.pad(patches, ((0, 0), (0, Kp - K)))
    return patches.astype(jnp.bfloat16), Ho, Wo


def conv_block(patches, w_mat, bss, *, tm_max=1024):
    """patches: [M, K] bf16; w_mat: [K, 128] bf16; bss: [3, 128] f32 -> [M_pad, 128] bf16."""
    M, K = patches.shape
    CP = w_mat.shape[1]
    tm = min(tm_max, _round_up(M, 16))
    M_pad = _round_up(M, tm)
    if M_pad != M:
        patches = jnp.pad(patches, ((0, M_pad - M), (0, 0)))
    return pl.pallas_call(
        _conv_block_kernel,
        out_shape=jax.ShapeDtypeStruct((M_pad, CP), jnp.bfloat16),
        grid=(M_pad // tm,),
        in_specs=[
            pl.BlockSpec((tm, K), lambda i: (i, 0)),
            pl.BlockSpec((K, CP), lambda i: (0, 0)),
            pl.BlockSpec((3, CP), lambda i: (0, 0)),
        ],
        out_specs=pl.BlockSpec((tm, CP), lambda i: (i, 0)),
        compiler_params=_COMPILER_PARAMS,
    )(patches, w_mat, bss)


def last_block_with_heads(patches, w_mat, bss, head_w, head_b, n, n_classes, *, tm_max=512):
    """Fused block-4 + heads (ds_size==1).  Returns validity [n,1], label [n,n_classes]."""
    M, K = patches.shape
    CP = w_mat.shape[1]
    F, HP = head_w.shape
    tm = min(tm_max, _round_up(M, 16))
    M_pad = _round_up(M, tm)
    if M_pad != M:
        patches = jnp.pad(patches, ((0, M_pad - M), (0, 0)))
    out = pl.pallas_call(
        functools.partial(_last_block_heads_kernel, n_classes),
        out_shape=jax.ShapeDtypeStruct((M_pad, HP), jnp.float32),
        grid=(M_pad // tm,),
        in_specs=[
            pl.BlockSpec((tm, K), lambda i: (i, 0)),
            pl.BlockSpec((K, CP), lambda i: (0, 0)),
            pl.BlockSpec((3, CP), lambda i: (0, 0)),
            pl.BlockSpec((F, HP), lambda i: (0, 0)),
            pl.BlockSpec((1, HP), lambda i: (0, 0)),
        ],
        out_specs=pl.BlockSpec((tm, HP), lambda i: (i, 0)),
        compiler_params=_COMPILER_PARAMS,
    )(patches, w_mat, bss, head_w, head_b)
    return out[:n, n_classes:n_classes + 1], out[:n, :n_classes]


def heads(feat, head_w, head_b, n_classes, *, tm_max=512):
    """feat: [N, F] bf16 in NHWC-flatten order (head_w rows pre-permuted to match)."""
    N, F = feat.shape
    HP = head_w.shape[1]
    tm = min(tm_max, _round_up(N, 16))
    M_pad = _round_up(N, tm)
    if M_pad != N:
        feat = jnp.pad(feat, ((0, M_pad - N), (0, 0)))
    out = pl.pallas_call(
        functools.partial(_heads_kernel, n_classes),
        out_shape=jax.ShapeDtypeStruct((M_pad, HP), jnp.float32),
        grid=(M_pad // tm,),
        in_specs=[
            pl.BlockSpec((tm, F), lambda i: (i, 0)),
            pl.BlockSpec((F, HP), lambda i: (0, 0)),
            pl.BlockSpec((1, HP), lambda i: (0, 0)),
        ],
        out_specs=pl.BlockSpec((tm, HP), lambda i: (i, 0)),
        compiler_params=_COMPILER_PARAMS,
    )(feat, head_w, head_b)
    return out[:N, n_classes:n_classes + 1], out[:N, :n_classes]


# ---------------------------------------------------------------------------
# Parameters (PyTorch layout) and their lane-dense kernel preparation
# ---------------------------------------------------------------------------
def init_params(key, channels, img_size, n_classes):
    """Deterministic params, shapes per Discriminator.__init__ (PyTorch layout)."""
    filters = [channels, 16, 32, 64, 128]
    blocks = []
    for li in range(4):
        cin, cout = filters[li], filters[li + 1]
        key, kw, kb, kg, kbeta, km, kv = jax.random.split(key, 7)
        w = 0.1 * jax.random.normal(kw, (cout, cin, 3, 3), jnp.float32)
        b = 0.05 * jax.random.normal(kb, (cout,), jnp.float32)
        if li == 0:          # first block has bn=False
            scale = jnp.ones((cout,), jnp.float32)
            shift = jnp.zeros((cout,), jnp.float32)
        else:                # fold eval-mode BatchNorm2d(cout, eps=0.8) into scale/shift
            gamma = 1.0 + 0.1 * jax.random.normal(kg, (cout,), jnp.float32)
            beta = 0.05 * jax.random.normal(kbeta, (cout,), jnp.float32)
            rmean = 0.05 * jax.random.normal(km, (cout,), jnp.float32)
            rvar = jax.random.uniform(kv, (cout,), jnp.float32, 0.5, 1.5)
            scale = gamma / jnp.sqrt(rvar + BN_EPS)
            shift = beta - rmean * scale
        blocks.append(dict(w=w, b=b, scale=scale, shift=shift))

    ds_size = img_size // 2 ** 4
    feat_dim = 128 * ds_size ** 2
    key, k1, k2, k3, k4 = jax.random.split(key, 5)
    adv_w = 0.1 * jax.random.normal(k1, (1, feat_dim), jnp.float32)          # Linear(feat, 1)
    adv_b = 0.05 * jax.random.normal(k2, (1,), jnp.float32)
    aux_w = 0.1 * jax.random.normal(k3, (n_classes, feat_dim), jnp.float32)  # Linear(feat, n_classes)
    aux_b = 0.05 * jax.random.normal(k4, (n_classes,), jnp.float32)
    return dict(blocks=blocks, adv_w=adv_w, adv_b=adv_b, aux_w=aux_w, aux_b=aux_b)


def prepare_params(params, n_classes, img_size):
    """Pad/transpose PyTorch-layout params into the lane-dense kernel layout (done once)."""
    blocks = []
    for blk in params["blocks"]:
        w, b, scale, shift = blk["w"], blk["b"], blk["scale"], blk["shift"]
        cout, cin = w.shape[0], w.shape[1]
        K = KSIZE * KSIZE * cin
        Kp = _round_up(K, 128)
        # (cout, cin, kh, kw) -> (kh, kw, cin, cout) -> (9*cin, cout): matches im2col cols.
        w_mat = jnp.transpose(w, (2, 3, 1, 0)).reshape(K, cout)
        w_mat = jnp.pad(w_mat, ((0, Kp - K), (0, COUT_PAD - cout)))   # K-trimmed, lane-dense
        bss = jnp.stack([
            jnp.pad(b, (0, COUT_PAD - cout)),
            jnp.pad(scale, (0, COUT_PAD - cout), constant_values=1.0),
            jnp.pad(shift, (0, COUT_PAD - cout)),
        ]).astype(jnp.float32)                                        # (3, 128)
        blocks.append(dict(w=w_mat.astype(jnp.bfloat16), bss=bss))

    ds = img_size // 2 ** 4
    feat_dim = 128 * ds * ds
    # Combined head weight: cols [0, n_classes) = aux (softmax), col n_classes = adv (sigmoid).
    hw_pt = jnp.concatenate([params["aux_w"], params["adv_w"]], axis=0).T  # (feat_dim, ncls+1)
    # Permute rows from PyTorch NCHW-flatten (c, h, w) order into NHWC-flatten (h, w, c)
    # order so the kernel-side feature flatten needs no XLA transpose.
    hw = hw_pt.reshape(128, ds, ds, n_classes + 1)
    hw = jnp.transpose(hw, (1, 2, 0, 3)).reshape(feat_dim, n_classes + 1)
    hb = jnp.concatenate([params["aux_b"], params["adv_b"]]).reshape(1, -1)
    hw = jnp.pad(hw, ((0, 0), (0, HEAD_PAD - (n_classes + 1)))).astype(jnp.bfloat16)
    hb = jnp.pad(hb, ((0, 0), (0, HEAD_PAD - (n_classes + 1)))).astype(jnp.float32)
    return dict(blocks=blocks, head_w=hw, head_b=hb)


# ---------------------------------------------------------------------------
# Forward pass
# ---------------------------------------------------------------------------
@functools.partial(jax.jit, static_argnames=("n_classes",))
def discriminator_forward(img, prep, *, n_classes):
    """img: [N, C, H, W] (PyTorch NCHW) -> (validity [N,1], label [N,n_classes])."""
    N, C = img.shape[0], img.shape[1]
    cins = (C, 16, 32, 64)                                       # per-block real in-channels
    x = jnp.transpose(img, (0, 2, 3, 1))                         # NHWC once at the boundary

    blocks = prep["blocks"]
    for li, blk in enumerate(blocks[:-1]):
        patches, Ho, Wo = _im2col_nhwc(x, cins[li])
        out = conv_block(patches, blk["w"], blk["bss"])          # (M_pad, 128) bf16
        M = N * Ho * Wo
        x = out[:M].reshape(N, Ho, Wo, COUT_PAD)                 # stay NHWC (no transposes)

    last = blocks[-1]
    patches, Ho, Wo = _im2col_nhwc(x, cins[-1])
    if Ho == 1 and Wo == 1:
        # Block 4 + both heads fused in one pallas_call; feat never hits HBM.
        return last_block_with_heads(patches, last["w"], last["bss"],
                                     prep["head_w"], prep["head_b"], N, n_classes)

    # General ds_size > 1 path: run block 4, flatten in NHWC order (head_w rows were
    # pre-permuted to match), then the standalone heads kernel.
    out = conv_block(patches, last["w"], last["bss"])
    M = N * Ho * Wo
    feat = out[:M].reshape(N, Ho * Wo * COUT_PAD)                # last block Cout == 128
    return heads(feat, prep["head_w"], prep["head_b"], n_classes)


# ---------------------------------------------------------------------------
# Pure-JAX reference (eval-mode) for correctness checking
# ---------------------------------------------------------------------------
def _reference_forward(img, params):
    x = img
    for blk in params["blocks"]:
        y = lax.conv_general_dilated(x, blk["w"], (2, 2), ((1, 1), (1, 1)),
                                     dimension_numbers=("NCHW", "OIHW", "NCHW"))
        y = y + blk["b"][None, :, None, None]
        y = jnp.where(y > 0, y, LEAK * y)
        x = y * blk["scale"][None, :, None, None] + blk["shift"][None, :, None, None]
    feat = x.reshape(x.shape[0], -1)
    adv = jax.nn.sigmoid(feat @ params["adv_w"].T + params["adv_b"])
    aux = jax.nn.softmax(feat @ params["aux_w"].T + params["aux_b"], axis=-1)
    return adv, aux


# ---------------------------------------------------------------------------
if __name__ == "__main__":
    # opt.channels = 4, opt.img_size = 16, opt.n_classes = 10, batch = 2
    channels, img_size, n_classes, batch = 4, 16, 10, 2

    key = jax.random.PRNGKey(0)
    key, kimg = jax.random.split(key)
    img = jax.random.normal(kimg, (batch, channels, img_size, img_size), jnp.float32)

    params = init_params(key, channels, img_size, n_classes)
    prep = prepare_params(params, n_classes, img_size)

    validity, label = discriminator_forward(img, prep, n_classes=n_classes)
    jax.block_until_ready((validity, label))

    assert validity.shape == (batch, 1)
    assert label.shape == (batch, n_classes)
    assert bool(jnp.all(jnp.isfinite(validity))) and bool(jnp.all(jnp.isfinite(label)))

    ref_v, ref_l = _reference_forward(img, params)
    assert bool(jnp.allclose(validity, ref_v, atol=5e-2)), "validity mismatch vs reference"
    assert bool(jnp.allclose(label, ref_l, atol=5e-2)), "label mismatch vs reference"

    print("KERNEL_OK")
</pallas_src>

<mosaic_0001>
module attributes {stable_mosaic.version = 11 : i64} {
  func.func @_conv_block_kernel(%arg0: i32, %arg1: memref<128x128xbf16, #tpu.memory_space<vmem>>, %arg2: memref<128x128xbf16, #tpu.memory_space<vmem>>, %arg3: memref<3x128xf32, #tpu.memory_space<vmem>>, %arg4: memref<128x128xbf16, #tpu.memory_space<vmem>>) attributes {dimension_semantics = [#tpu.dimension_semantics<parallel>], iteration_bounds = array<i64: 1>, scalar_prefetch = 0 : i64, scratch_operands = 0 : i64, tpu.core_type = #tpu.core_type<tc>, window_params = [{transform_indices = @transform_0, window_bounds = array<i64: 128, 128>}, {pipeline_mode = #tpu.pipeline_mode<synchronous>, transform_indices = @transform_1, window_bounds = array<i64: 128, 128>}, {pipeline_mode = #tpu.pipeline_mode<synchronous>, transform_indices = @transform_2, window_bounds = array<i64: 3, 128>}, {transform_indices = @transform_3, window_bounds = array<i64: 128, 128>}]} {
    %c0 = arith.constant 0 : index
    %c0_0 = arith.constant 0 : index
    %0 = vector.load %arg1[%c0, %c0_0] : memref<128x128xbf16, #tpu.memory_space<vmem>>, vector<128x128xbf16>
    %c0_1 = arith.constant 0 : index
    %c0_2 = arith.constant 0 : index
    %1 = vector.load %arg2[%c0_1, %c0_2] : memref<128x128xbf16, #tpu.memory_space<vmem>>, vector<128x128xbf16>
    %cst = arith.constant dense<0.000000e+00> : vector<128x128xf32>
    %2 = tpu.matmul %0, %1, %cst {dimension_numbers = #tpu.dot_dimension_numbers<[1], [0], [0], [1], [0, 0, 1, 1], [], []>} : vector<128x128xbf16>, vector<128x128xbf16>, vector<128x128xf32> -> vector<128x128xf32>
    %c0_3 = arith.constant 0 : index
    %c0_4 = arith.constant 0 : index
    %3 = vector.load %arg3[%c0_3, %c0_4] : memref<3x128xf32, #tpu.memory_space<vmem>>, vector<3x128xf32>
    %4 = vector.extract_strided_slice %3 {offsets = [0, 0], sizes = [1, 128], strides = [1, 1]} : vector<3x128xf32> to vector<1x128xf32>
    %5 = vector.broadcast %4 : vector<1x128xf32> to vector<128x128xf32>
    %6 = arith.addf %2, %5 : vector<128x128xf32>
    %cst_5 = arith.constant 0.000000e+00 : f32
    %7 = vector.broadcast %cst_5 : f32 to vector<128x128xf32>
    %8 = arith.cmpf ogt, %6, %7 : vector<128x128xf32>
    %cst_6 = arith.constant 2.000000e-01 : f32
    %9 = vector.broadcast %cst_6 : f32 to vector<128x128xf32>
    %10 = arith.mulf %9, %6 : vector<128x128xf32>
    %11 = arith.select %8, %6, %10 : vector<128x128xi1>, vector<128x128xf32>
    %12 = vector.extract_strided_slice %3 {offsets = [1, 0], sizes = [1, 128], strides = [1, 1]} : vector<3x128xf32> to vector<1x128xf32>
    %13 = vector.broadcast %12 : vector<1x128xf32> to vector<128x128xf32>
    %14 = arith.mulf %11, %13 : vector<128x128xf32>
    %15 = vector.extract_strided_slice %3 {offsets = [2, 0], sizes = [1, 128], strides = [1, 1]} : vector<3x128xf32> to vector<1x128xf32>
    %16 = vector.broadcast %15 : vector<1x128xf32> to vector<128x128xf32>
    %17 = arith.addf %14, %16 : vector<128x128xf32>
    %18 = arith.truncf %17 : vector<128x128xf32> to vector<128x128xbf16>
    %c0_7 = arith.constant 0 : index
    %c0_8 = arith.constant 0 : index
    %19 = vector.load %arg4[%c0_7, %c0_8] : memref<128x128xbf16, #tpu.memory_space<vmem>>, vector<128x128xbf16>
    tpu.vector_store %arg4[%c0_7, %c0_8], %18 {strides = array<i32>} : memref<128x128xbf16, #tpu.memory_space<vmem>>, vector<128x128xbf16>,
    return
  }
  func.func @transform_0(%arg0: i32) -> (i32, i32) {
    %c0_i32 = arith.constant 0 : i32
    %c0_i32_0 = arith.constant 0 : i32
    return %arg0, %c0_i32 : i32, i32
  }
  func.func @transform_1(%arg0: i32) -> (i32, i32) {
    %c0_i32 = arith.constant 0 : i32
    %c0_i32_0 = arith.constant 0 : i32
    %c0_i32_1 = arith.constant 0 : i32
    return %c0_i32, %c0_i32_0 : i32, i32
  }
  func.func @transform_2(%arg0: i32) -> (i32, i32) {
    %c0_i32 = arith.constant 0 : i32
    %c0_i32_0 = arith.constant 0 : i32
    %c0_i32_1 = arith.constant 0 : i32
    return %c0_i32, %c0_i32_0 : i32, i32
  }
  func.func @transform_3(%arg0: i32) -> (i32, i32) {
    %c0_i32 = arith.constant 0 : i32
    %c0_i32_0 = arith.constant 0 : i32
    return %arg0, %c0_i32 : i32, i32
  }
}

module attributes {stable_mosaic.version = 11 : i64} {
  func.func @_conv_block_kernel(%arg0: i32, %arg1: memref<32x256xbf16, #tpu.memory_space<vmem>>, %arg2: memref<256x128xbf16, #tpu.memory_space<vmem>>, %arg3: memref<3x128xf32, #tpu.memory_space<vmem>>, %arg4: memref<32x128xbf16, #tpu.memory_space<vmem>>) attributes {dimension_semantics = [#tpu.dimension_semantics<parallel>], iteration_bounds = array<i64: 1>, scalar_prefetch = 0 : i64, scratch_operands = 0 : i64, tpu.core_type = #tpu.core_type<tc>, window_params = [{transform_indices = @transform_0, window_bounds = array<i64: 32, 256>}, {pipeline_mode = #tpu.pipeline_mode<synchronous>, transform_indices = @transform_1, window_bounds = array<i64: 256, 128>}, {pipeline_mode = #tpu.pipeline_mode<synchronous>, transform_indices = @transform_2, window_bounds = array<i64: 3, 128>}, {transform_indices = @transform_3, window_bounds = array<i64: 32, 128>}]} {
    %c0 = arith.constant 0 : index
    %c0_0 = arith.constant 0 : index
    %0 = vector.load %arg1[%c0, %c0_0] : memref<32x256xbf16, #tpu.memory_space<vmem>>, vector<32x256xbf16>
    %c0_1 = arith.constant 0 : index
    %c0_2 = arith.constant 0 : index
    %1 = vector.load %arg2[%c0_1, %c0_2] : memref<256x128xbf16, #tpu.memory_space<vmem>>, vector<256x128xbf16>
    %cst = arith.constant dense<0.000000e+00> : vector<32x128xf32>
    %2 = tpu.matmul %0, %1, %cst {dimension_numbers = #tpu.dot_dimension_numbers<[1], [0], [0], [1], [0, 0, 1, 1], [], []>} : vector<32x256xbf16>, vector<256x128xbf16>, vector<32x128xf32> -> vector<32x128xf32>
    %c0_3 = arith.constant 0 : index
    %c0_4 = arith.constant 0 : index
    %3 = vector.load %arg3[%c0_3, %c0_4] : memref<3x128xf32, #tpu.memory_space<vmem>>, vector<3x128xf32>
    %4 = vector.extract_strided_slice %3 {offsets = [0, 0], sizes = [1, 128], strides = [1, 1]} : vector<3x128xf32> to vector<1x128xf32>
    %5 = vector.broadcast %4 : vector<1x128xf32> to vector<32x128xf32>
    %6 = arith.addf %2, %5 : vector<32x128xf32>
    %cst_5 = arith.constant 0.000000e+00 : f32
    %7 = vector.broadcast %cst_5 : f32 to vector<32x128xf32>
    %8 = arith.cmpf ogt, %6, %7 : vector<32x128xf32>
    %cst_6 = arith.constant 2.000000e-01 : f32
    %9 = vector.broadcast %cst_6 : f32 to vector<32x128xf32>
    %10 = arith.mulf %9, %6 : vector<32x128xf32>
    %11 = arith.select %8, %6, %10 : vector<32x128xi1>, vector<32x128xf32>
    %12 = vector.extract_strided_slice %3 {offsets = [1, 0], sizes = [1, 128], strides = [1, 1]} : vector<3x128xf32> to vector<1x128xf32>
    %13 = vector.broadcast %12 : vector<1x128xf32> to vector<32x128xf32>
    %14 = arith.mulf %11, %13 : vector<32x128xf32>
    %15 = vector.extract_strided_slice %3 {offsets = [2, 0], sizes = [1, 128], strides = [1, 1]} : vector<3x128xf32> to vector<1x128xf32>
    %16 = vector.broadcast %15 : vector<1x128xf32> to vector<32x128xf32>
    %17 = arith.addf %14, %16 : vector<32x128xf32>
    %18 = arith.truncf %17 : vector<32x128xf32> to vector<32x128xbf16>
    %c0_7 = arith.constant 0 : index
    %c0_8 = arith.constant 0 : index
    %19 = vector.load %arg4[%c0_7, %c0_8] : memref<32x128xbf16, #tpu.memory_space<vmem>>, vector<32x128xbf16>
    tpu.vector_store %arg4[%c0_7, %c0_8], %18 {strides = array<i32>} : memref<32x128xbf16, #tpu.memory_space<vmem>>, vector<32x128xbf16>,
    return
  }
  func.func @transform_0(%arg0: i32) -> (i32, i32) {
    %c0_i32 = arith.constant 0 : i32
    %c0_i32_0 = arith.constant 0 : i32
    return %arg0, %c0_i32 : i32, i32
  }
  func.func @transform_1(%arg0: i32) -> (i32, i32) {
    %c0_i32 = arith.constant 0 : i32
    %c0_i32_0 = arith.constant 0 : i32
    %c0_i32_1 = arith.constant 0 : i32
    return %c0_i32, %c0_i32_0 : i32, i32
  }
  func.func @transform_2(%arg0: i32) -> (i32, i32) {
    %c0_i32 = arith.constant 0 : i32
    %c0_i32_0 = arith.constant 0 : i32
    %c0_i32_1 = arith.constant 0 : i32
    return %c0_i32, %c0_i32_0 : i32, i32
  }
  func.func @transform_3(%arg0: i32) -> (i32, i32) {
    %c0_i32 = arith.constant 0 : i32
    %c0_i32_0 = arith.constant 0 : i32
    return %arg0, %c0_i32 : i32, i32
  }
}

module attributes {stable_mosaic.version = 11 : i64} {
  func.func @_conv_block_kernel(%arg0: i32, %arg1: memref<16x384xbf16, #tpu.memory_space<vmem>>, %arg2: memref<384x128xbf16, #tpu.memory_space<vmem>>, %arg3: memref<3x128xf32, #tpu.memory_space<vmem>>, %arg4: memref<16x128xbf16, #tpu.memory_space<vmem>>) attributes {dimension_semantics = [#tpu.dimension_semantics<parallel>], iteration_bounds = array<i64: 1>, scalar_prefetch = 0 : i64, scratch_operands = 0 : i64, tpu.core_type = #tpu.core_type<tc>, window_params = [{transform_indices = @transform_0, window_bounds = array<i64: 16, 384>}, {pipeline_mode = #tpu.pipeline_mode<synchronous>, transform_indices = @transform_1, window_bounds = array<i64: 384, 128>}, {pipeline_mode = #tpu.pipeline_mode<synchronous>, transform_indices = @transform_2, window_bounds = array<i64: 3, 128>}, {transform_indices = @transform_3, window_bounds = array<i64: 16, 128>}]} {
    %c0 = arith.constant 0 : index
    %c0_0 = arith.constant 0 : index
    %0 = vector.load %arg1[%c0, %c0_0] : memref<16x384xbf16, #tpu.memory_space<vmem>>, vector<16x384xbf16>
    %c0_1 = arith.constant 0 : index
    %c0_2 = arith.constant 0 : index
    %1 = vector.load %arg2[%c0_1, %c0_2] : memref<384x128xbf16, #tpu.memory_space<vmem>>, vector<384x128xbf16>
    %cst = arith.constant dense<0.000000e+00> : vector<16x128xf32>
    %2 = tpu.matmul %0, %1, %cst {dimension_numbers = #tpu.dot_dimension_numbers<[1], [0], [0], [1], [0, 0, 1, 1], [], []>} : vector<16x384xbf16>, vector<384x128xbf16>, vector<16x128xf32> -> vector<16x128xf32>
    %c0_3 = arith.constant 0 : index
    %c0_4 = arith.constant 0 : index
    %3 = vector.load %arg3[%c0_3, %c0_4] : memref<3x128xf32, #tpu.memory_space<vmem>>, vector<3x128xf32>
    %4 = vector.extract_strided_slice %3 {offsets = [0, 0], sizes = [1, 128], strides = [1, 1]} : vector<3x128xf32> to vector<1x128xf32>
    %5 = vector.broadcast %4 : vector<1x128xf32> to vector<16x128xf32>
    %6 = arith.addf %2, %5 : vector<16x128xf32>
    %cst_5 = arith.constant 0.000000e+00 : f32
    %7 = vector.broadcast %cst_5 : f32 to vector<16x128xf32>
    %8 = arith.cmpf ogt, %6, %7 : vector<16x128xf32>
    %cst_6 = arith.constant 2.000000e-01 : f32
    %9 = vector.broadcast %cst_6 : f32 to vector<16x128xf32>
    %10 = arith.mulf %9, %6 : vector<16x128xf32>
    %11 = arith.select %8, %6, %10 : vector<16x128xi1>, vector<16x128xf32>
    %12 = vector.extract_strided_slice %3 {offsets = [1, 0], sizes = [1, 128], strides = [1, 1]} : vector<3x128xf32> to vector<1x128xf32>
    %13 = vector.broadcast %12 : vector<1x128xf32> to vector<16x128xf32>
    %14 = arith.mulf %11, %13 : vector<16x128xf32>
    %15 = vector.extract_strided_slice %3 {offsets = [2, 0], sizes = [1, 128], strides = [1, 1]} : vector<3x128xf32> to vector<1x128xf32>
    %16 = vector.broadcast %15 : vector<1x128xf32> to vector<16x128xf32>
    %17 = arith.addf %14, %16 : vector<16x128xf32>
    %18 = arith.truncf %17 : vector<16x128xf32> to vector<16x128xbf16>
    %c0_7 = arith.constant 0 : index
    %c0_8 = arith.constant 0 : index
    %19 = vector.load %arg4[%c0_7, %c0_8] : memref<16x128xbf16, #tpu.memory_space<vmem>>, vector<16x128xbf16>
    tpu.vector_store %arg4[%c0_7, %c0_8], %18 {strides = array<i32>} : memref<16x128xbf16, #tpu.memory_space<vmem>>, vector<16x128xbf16>,
    return
  }
  func.func @transform_0(%arg0: i32) -> (i32, i32) {
    %c0_i32 = arith.constant 0 : i32
    %c0_i32_0 = arith.constant 0 : i32
    return %arg0, %c0_i32 : i32, i32
  }
  func.func @transform_1(%arg0: i32) -> (i32, i32) {
    %c0_i32 = arith.constant 0 : i32
    %c0_i32_0 = arith.constant 0 : i32
    %c0_i32_1 = arith.constant 0 : i32
    return %c0_i32, %c0_i32_0 : i32, i32
  }
  func.func @transform_2(%arg0: i32) -> (i32, i32) {
    %c0_i32 = arith.constant 0 : i32
    %c0_i32_0 = arith.constant 0 : i32
    %c0_i32_1 = arith.constant 0 : i32
    return %c0_i32, %c0_i32_0 : i32, i32
  }
  func.func @transform_3(%arg0: i32) -> (i32, i32) {
    %c0_i32 = arith.constant 0 : i32
    %c0_i32_0 = arith.constant 0 : i32
    return %arg0, %c0_i32 : i32, i32
  }
}

module attributes {stable_mosaic.version = 11 : i64} {
  func.func @_last_block_heads_kernel(%arg0: i32, %arg1: memref<16x640xbf16, #tpu.memory_space<vmem>>, %arg2: memref<640x128xbf16, #tpu.memory_space<vmem>>, %arg3: memref<3x128xf32, #tpu.memory_space<vmem>>, %arg4: memref<128x128xbf16, #tpu.memory_space<vmem>>, %arg5: memref<1x128xf32, #tpu.memory_space<vmem>>, %arg6: memref<16x128xf32, #tpu.memory_space<vmem>>) attributes {dimension_semantics = [#tpu.dimension_semantics<parallel>], iteration_bounds = array<i64: 1>, scalar_prefetch = 0 : i64, scratch_operands = 0 : i64, tpu.core_type = #tpu.core_type<tc>, window_params = [{transform_indices = @transform_0, window_bounds = array<i64: 16, 640>}, {pipeline_mode = #tpu.pipeline_mode<synchronous>, transform_indices = @transform_1, window_bounds = array<i64: 640, 128>}, {pipeline_mode = #tpu.pipeline_mode<synchronous>, transform_indices = @transform_2, window_bounds = array<i64: 3, 128>}, {pipeline_mode = #tpu.pipeline_mode<synchronous>, transform_indices = @transform_3, window_bounds = array<i64: 128, 128>}, {pipeline_mode = #tpu.pipeline_mode<synchronous>, transform_indices = @transform_4, window_bounds = array<i64: 1, 128>}, {transform_indices = @transform_5, window_bounds = array<i64: 16, 128>}]} {
    %c0 = arith.constant 0 : index
    %c0_0 = arith.constant 0 : index
    %0 = vector.load %arg1[%c0, %c0_0] : memref<16x640xbf16, #tpu.memory_space<vmem>>, vector<16x640xbf16>
    %c0_1 = arith.constant 0 : index
    %c0_2 = arith.constant 0 : index
    %1 = vector.load %arg2[%c0_1, %c0_2] : memref<640x128xbf16, #tpu.memory_space<vmem>>, vector<640x128xbf16>
    %cst = arith.constant dense<0.000000e+00> : vector<16x128xf32>
    %2 = tpu.matmul %0, %1, %cst {dimension_numbers = #tpu.dot_dimension_numbers<[1], [0], [0], [1], [0, 0, 1, 1], [], []>} : vector<16x640xbf16>, vector<640x128xbf16>, vector<16x128xf32> -> vector<16x128xf32>
    %c0_3 = arith.constant 0 : index
    %c0_4 = arith.constant 0 : index
    %3 = vector.load %arg3[%c0_3, %c0_4] : memref<3x128xf32, #tpu.memory_space<vmem>>, vector<3x128xf32>
    %4 = vector.extract_strided_slice %3 {offsets = [0, 0], sizes = [1, 128], strides = [1, 1]} : vector<3x128xf32> to vector<1x128xf32>
    %5 = vector.broadcast %4 : vector<1x128xf32> to vector<16x128xf32>
    %6 = arith.addf %2, %5 : vector<16x128xf32>
    %cst_5 = arith.constant 0.000000e+00 : f32
    %7 = vector.broadcast %cst_5 : f32 to vector<16x128xf32>
    %8 = arith.cmpf ogt, %6, %7 : vector<16x128xf32>
    %cst_6 = arith.constant 2.000000e-01 : f32
    %9 = vector.broadcast %cst_6 : f32 to vector<16x128xf32>
    %10 = arith.mulf %9, %6 : vector<16x128xf32>
    %11 = arith.select %8, %6, %10 : vector<16x128xi1>, vector<16x128xf32>
    %12 = vector.extract_strided_slice %3 {offsets = [1, 0], sizes = [1, 128], strides = [1, 1]} : vector<3x128xf32> to vector<1x128xf32>
    %13 = vector.broadcast %12 : vector<1x128xf32> to vector<16x128xf32>
    %14 = arith.mulf %11, %13 : vector<16x128xf32>
    %15 = vector.extract_strided_slice %3 {offsets = [2, 0], sizes = [1, 128], strides = [1, 1]} : vector<3x128xf32> to vector<1x128xf32>
    %16 = vector.broadcast %15 : vector<1x128xf32> to vector<16x128xf32>
    %17 = arith.addf %14, %16 : vector<16x128xf32>
    %18 = arith.truncf %17 : vector<16x128xf32> to vector<16x128xbf16>
    %c0_7 = arith.constant 0 : index
    %c0_8 = arith.constant 0 : index
    %19 = vector.load %arg4[%c0_7, %c0_8] : memref<128x128xbf16, #tpu.memory_space<vmem>>, vector<128x128xbf16>
    %cst_9 = arith.constant dense<0.000000e+00> : vector<16x128xf32>
    %20 = tpu.matmul %18, %19, %cst_9 {dimension_numbers = #tpu.dot_dimension_numbers<[1], [0], [0], [1], [0, 0, 1, 1], [], []>} : vector<16x128xbf16>, vector<128x128xbf16>, vector<16x128xf32> -> vector<16x128xf32>
    %c0_10 = arith.constant 0 : index
    %c0_11 = arith.constant 0 : index
    %21 = vector.load %arg5[%c0_10, %c0_11] : memref<1x128xf32, #tpu.memory_space<vmem>>, vector<1x128xf32>
    %22 = vector.broadcast %21 : vector<1x128xf32> to vector<16x128xf32>
    %23 = arith.addf %20, %22 : vector<16x128xf32>
    %24 = tpu.iota {dimensions = array<i32: 1>} : vector<16x128xi32>
    %c10_i32 = arith.constant 10 : i32
    %25 = vector.broadcast %c10_i32 : i32 to vector<16x128xi32>
    %26 = arith.cmpi slt, %24, %25 : vector<16x128xi32>
    %cst_12 = arith.constant 0xFF800000 : f32
    %27 = vector.broadcast %cst_12 : f32 to vector<16x128xf32>
    %28 = arith.select %26, %23, %27 : vector<16x128xi1>, vector<16x128xf32>
    %cst_13 = arith.constant dense<0xFF800000> : vector<16xf32>
    %29 = vector.multi_reduction <maximumf>, %28, %cst_13 [1] : vector<16x128xf32> to vector<16xf32>
    %30 = vector.shape_cast %29 : vector<16xf32> to vector<16x1xf32>
    %31 = vector.broadcast %30 : vector<16x1xf32> to vector<16x128xf32>
    %32 = arith.subf %28, %31 : vector<16x128xf32>
    %33 = math.exp %32 : vector<16x128xf32>
    %cst_14 = arith.constant dense<0.000000e+00> : vector<16xf32>
    %34 = vector.multi_reduction <add>, %33, %cst_14 [1] : vector<16x128xf32> to vector<16xf32>
    %35 = vector.shape_cast %34 : vector<16xf32> to vector<16x1xf32>
    %36 = tpu.reciprocal %35 {approx = true} : vector<16x1xf32> -> vector<16x1xf32>
    %37 = vector.broadcast %36 : vector<16x1xf32> to vector<16x128xf32>
    %38 = arith.mulf %33, %37 : vector<16x128xf32>
    %39 = math.absf %23 : vector<16x128xf32>
    %cst_15 = arith.constant 0.000000e+00 : f32
    %40 = vector.broadcast %cst_15 : f32 to vector<16x128xf32>
    %41 = arith.subf %40, %39 : vector<16x128xf32>
    %42 = math.exp %41 : vector<16x128xf32>
    %cst_16 = arith.constant 0.000000e+00 : f32
    %43 = vector.broadcast %cst_16 : f32 to vector<16x128xf32>
    %44 = arith.cmpf oge, %23, %43 : vector<16x128xf32>
    %cst_17 = arith.constant 1.000000e+00 : f32
    %45 = vector.broadcast %cst_17 : f32 to vector<16x128xf32>
    %46 = arith.addf %45, %42 : vector<16x128xf32>
    %cst_18 = arith.constant 1.000000e+00 : f32
    %47 = vector.broadcast %cst_18 : f32 to vector<16x128xf32>
    %48 = arith.divf %47, %46 : vector<16x128xf32>
    %cst_19 = arith.constant 1.000000e+00 : f32
    %49 = vector.broadcast %cst_19 : f32 to vector<16x128xf32>
    %50 = arith.addf %49, %42 : vector<16x128xf32>
    %51 = arith.divf %42, %50 : vector<16x128xf32>
    %52 = arith.select %44, %48, %51 : vector<16x128xi1>, vector<16x128xf32>
    %c10_i32_20 = arith.constant 10 : i32
    %53 = vector.broadcast %c10_i32_20 : i32 to vector<16x128xi32>
    %54 = arith.cmpi eq, %24, %53 : vector<16x128xi32>
    %cst_21 = arith.constant 0.000000e+00 : f32
    %55 = vector.broadcast %cst_21 : f32 to vector<16x128xf32>
    %56 = arith.select %54, %52, %55 : vector<16x128xi1>, vector<16x128xf32>
    %57 = arith.select %26, %38, %56 : vector<16x128xi1>, vector<16x128xf32>
    %c0_22 = arith.constant 0 : index
    %c0_23 = arith.constant 0 : index
    %58 = vector.load %arg6[%c0_22, %c0_23] : memref<16x128xf32, #tpu.memory_space<vmem>>, vector<16x128xf32>
    tpu.vector_store %arg6[%c0_22, %c0_23], %57 {strides = array<i32>} : memref<16x128xf32, #tpu.memory_space<vmem>>, vector<16x128xf32>,
    return
  }
  func.func @transform_0(%arg0: i32) -> (i32, i32) {
    %c0_i32 = arith.constant 0 : i32
    %c0_i32_0 = arith.constant 0 : i32
    return %arg0, %c0_i32 : i32, i32
  }
  func.func @transform_1(%arg0: i32) -> (i32, i32) {
    %c0_i32 = arith.constant 0 : i32
    %c0_i32_0 = arith.constant 0 : i32
    %c0_i32_1 = arith.constant 0 : i32
    return %c0_i32, %c0_i32_0 : i32, i32
  }
  func.func @transform_2(%arg0: i32) -> (i32, i32) {
    %c0_i32 = arith.constant 0 : i32
    %c0_i32_0 = arith.constant 0 : i32
    %c0_i32_1 = arith.constant 0 : i32
    return %c0_i32, %c0_i32_0 : i32, i32
  }
  func.func @transform_3(%arg0: i32) -> (i32, i32) {
    %c0_i32 = arith.constant 0 : i32
    %c0_i32_0 = arith.constant 0 : i32
    %c0_i32_1 = arith.constant 0 : i32
    return %c0_i32, %c0_i32_0 : i32, i32
  }
  func.func @transform_4(%arg0: i32) -> (i32, i32) {
    %c0_i32 = arith.constant 0 : i32
    %c0_i32_0 = arith.constant 0 : i32
    %c0_i32_1 = arith.constant 0 : i32
    return %c0_i32, %c0_i32_0 : i32, i32
  }
  func.func @transform_5(%arg0: i32) -> (i32, i32) {
    %c0_i32 = arith.constant 0 : i32
    %c0_i32_0 = arith.constant 0 : i32
    return %arg0, %c0_i32 : i32, i32
  }
}

</mosaic_0001>

<bundles_post_ra>
// kernel: discriminator_forward.4
= control target key start
LH: loop header
LB: loop body
LE: loop exit
PB: predicated region body
PF: predicated region fallthrough
CT: control target
= control target key end

     0   :  { %v48_v16 = vlaneseq  ;;  %s741_s1 = inlined_call_operand.vmem [shape: bf16[128,128], index: 1, kind: input, shape index: {}]   ;;  %s742_s0 = inlined_call_operand.vmem [shape: bf16[128,128], index: 0, kind: input, shape index: {}]   ;;  %s743_s2 = inlined_call_operand.vmem [shape: f32[3,128], index: 2, kind: input, shape index: {}]   ;;  %s744_s3 = inlined_call_operand.vmem [shape: bf16[128,128], index: 3, kind: output, shape index: {}]  }
   0x1   :  { %v576_v0 = vld [vmem:[%s741_s1] sm:$0xff]   ;;  %v577_v1 = vld [vmem:[%s741_s1 + $0x8] sm:$0xff]   ;;  %v578_v2 = vld [vmem:[%s741_s1 + $0x10] sm:$0xff]  }
   0x2   :  { %528 = vmatprep.subr.bf16.mxu0 %v576_v0  ;;  %560 = vmatprep.subr.bf16.mxu1 %v576_v0  ;;  %v579_v3 = vld [vmem:[%s741_s1 + $0x18] sm:$0xff]   ;;  %v584_v4 = vld [vmem:[%s742_s0] sm:$0xff]   ;;  %v581_v7 = vld [vmem:[%s741_s1 + $0x28] sm:$0xff]   ;;  %v49_v17 = vshrl.u32 %v48_v16, 7 }
   0x3   :  { %529 = vmatpush3.bf16.msra.mxu0 %v576_v0  ;;  %568 = vmatpush3.bf16.msra.mxu1 %v576_v0  ;;  %v585_v5 = vld [vmem:[%s742_s0 + $0x20] sm:$0xff]   ;;  %v582_v8 = vld [vmem:[%s741_s1 + $0x30] sm:$0xff]   ;;  %v583_v9 = vld [vmem:[%s741_s1 + $0x38] sm:$0xff]  }
   0x4   :  { %530 = vmatprep.subr.bf16.mxu0 %v577_v1  ;;  %561 = vmatprep.subr.bf16.mxu1 %v577_v1  ;;  %v580_v6 = vld [vmem:[%s741_s1 + $0x20] sm:$0xff]   ;;  %v586_v10 = vld [vmem:[%s742_s0 + $0x8] sm:$0xff]   ;;  %v588_v12 = vld [vmem:[%s742_s0 + $0x10] sm:$0xff]   ;;  %v50_v18 = vsub.s32 0, %v49_v17  ;;  %v295_v21 = vsub.s32 1, %v49_v17  ;;  %v315_v29 = vsub.s32 2, %v49_v17 }
   0x5   :  { %544 = vmatprep.mubr.bf16.mxu0 %v584_v4  ;;  %552 = vmatprep.mubr.bf16.mxu1 %v585_v5  ;;  %v587_v11 = vld [vmem:[%s742_s0 + $0x28] sm:$0xff]   ;;  %v589_v13 = vld [vmem:[%s742_s0 + $0x30] sm:$0xff]   ;;  %v590_v14 = vld [vmem:[%s742_s0 + $0x18] sm:$0xff]  }
   0x6   :  { %v591_v15 = vld [vmem:[%s742_s0 + $0x38] sm:$0xff]   ;;  %v47_v19 = vld [vmem:[%s743_s2] sm:$0x7] }
   0x7   :  { %531 = vmatpush3.bf16.msra.mxu0 %v577_v1  ;;  %569 = vmatpush3.bf16.msra.mxu1 %v577_v1  ;;  %v663_v20 = vrot.slane %v47_v19, %v50_v18  ;;  %v667_v28 = vrot.slane %v47_v19, %v295_v21  ;;  %v674_v47 = vrot.slane %v47_v19, %v315_v29 }
   0x8   :  { %532 = vmatprep.subr.bf16.mxu0 %v578_v2  ;;  %562 = vmatprep.subr.bf16.mxu1 %v578_v2 }
   0xb   :  { %533 = vmatpush3.bf16.msra.mxu0 %v578_v2  ;;  %570 = vmatpush3.bf16.msra.mxu1 %v578_v2 }
   0xc   :  { %534 = vmatprep.subr.bf16.mxu0 %v579_v3  ;;  %563 = vmatprep.subr.bf16.mxu1 %v579_v3 }
   0xf   :  { %535 = vmatpush3.bf16.msra.mxu0 %v579_v3  ;;  %571 = vmatpush3.bf16.msra.mxu1 %v579_v3 }
  0x10   :  { %536 = vmatprep.subr.bf16.mxu0 %v580_v6  ;;  %564 = vmatprep.subr.bf16.mxu1 %v580_v6 }
  0x13   :  { %537 = vmatpush3.bf16.msra.mxu0 %v580_v6  ;;  %572 = vmatpush3.bf16.msra.mxu1 %v580_v6 }
  0x14   :  { %538 = vmatprep.subr.bf16.mxu0 %v581_v7  ;;  %565 = vmatprep.subr.bf16.mxu1 %v581_v7 }
  0x17   :  { %539 = vmatpush3.bf16.msra.mxu0 %v581_v7  ;;  %573 = vmatpush3.bf16.msra.mxu1 %v581_v7 }
  0x18   :  { %540 = vmatprep.subr.bf16.mxu0 %v582_v8  ;;  %566 = vmatprep.subr.bf16.mxu1 %v582_v8 }
  0x1b   :  { %541 = vmatpush3.bf16.msra.mxu0 %v582_v8  ;;  %574 = vmatpush3.bf16.msra.mxu1 %v582_v8 }
  0x1c   :  { %542 = vmatprep.subr.bf16.mxu0 %v583_v9  ;;  %567 = vmatprep.subr.bf16.mxu1 %v583_v9 }
  0x1f   :  { %543 = vmatpush3.bf16.msra.mxu0 %v583_v9  ;;  %575 = vmatpush3.bf16.msra.mxu1 %v583_v9 }
  0x22   :  { %545 = vmatmul.mubr.bf16.vlgmr.msra.gmra.mrb[0].mxu0 %v586_v10  ;;  %553 = vmatmul.mubr.bf16.vlgmr.msra.gmra.mrb[0].mxu1 %v587_v11 }
  0x23   :  { %548 = vmatprep.mubr.bf16.mxu0 %v588_v12  ;;  %556 = vmatprep.mubr.bf16.mxu1 %v589_v13 }
  0x2a   :  { %549 = vmatmul.mubr.bf16.gmra.mrb[4].mxu0 %v590_v14  ;;  %557 = vmatmul.mubr.bf16.gmra.mrb[4].mxu1 %v591_v15 }
  0xf5   :  { %v546_v22 = vpop.f32.mrb[0].mxu0  ;;  %v554_v23 = vpop.f32.mrb[0].mxu1 }
  0xf6   :  { %v191_v24 = vadd.f32 %v546_v22, %v663_v20  ;;  %v223_v25 = vadd.f32 %v554_v23, %v663_v20  ;;  %v182_v26 = vpop.f32.mrb[1].mxu0  ;;  %v214_v27 = vpop.f32.mrb[1].mxu1 }
  0xf7   :  { %v183_v30 = vadd.f32 %v182_v26, %v663_v20  ;;  %v215_v31 = vadd.f32 %v214_v27, %v663_v20  ;;  %v547_v32 = vpop.f32.mrb[2].mxu0  ;;  %v555_v33 = vpop.f32.mrb[2].mxu1 }
  0xf8   :  { %vm247_vm0 = vcmp.gt.f32.partialorder %v191_v24, 0.0  ;;  %v263_v34 = vmul.f32 0.2, %v191_v24  ;;  %vm255_vm1 = vcmp.gt.f32.partialorder %v223_v25, 0.0  ;;  %v271_v35 = vmul.f32 0.2, %v223_v25 }
  0xf9   :  { %vm245_vm2 = vcmp.gt.f32.partialorder %v183_v30, 0.0  ;;  %v261_v36 = vmul.f32 0.2, %v183_v30  ;;  %vm253_vm3 = vcmp.gt.f32.partialorder %v215_v31, 0.0  ;;  %v269_v37 = vmul.f32 0.2, %v215_v31 }
  0xfa   :  { %v279_v38 = vsel %vm247_vm0, %v191_v24, %v263_v34  ;;  %v287_v39 = vsel %vm255_vm1, %v223_v25, %v271_v35  ;;  %v194_v40 = vadd.f32 %v547_v32, %v663_v20  ;;  %v226_v41 = vadd.f32 %v555_v33, %v663_v20  ;;  %v185_v42 = vpop.f32.mrb[3].mxu0  ;;  %v217_v43 = vpop.f32.mrb[3].mxu1 }
  0xfb   :  { %v277_v44 = vsel %vm245_vm2, %v183_v30, %v261_v36  ;;  %v285_v45 = vsel %vm253_vm3, %v215_v31, %v269_v37  ;;  %v299_v46 = vmul.f32 %v667_v28, %v279_v38  ;;  %v307_v49 = vmul.f32 %v667_v28, %v287_v39 }
  0xfc   :  { %vm248_vm4 = vcmp.gt.f32.partialorder %v194_v40, 0.0  ;;  %v264_v48 = vmul.f32 0.2, %v194_v40  ;;  %vm256_vm5 = vcmp.gt.f32.partialorder %v226_v41, 0.0  ;;  %v272_v50 = vmul.f32 0.2, %v226_v41 }
  0xfd   :  { %v550_v51 = vpop.f32.mrb[4].mxu0  ;;  %v558_v52 = vpop.f32.mrb[4].mxu1  ;;  %v297_v53 = vmul.f32 %v667_v28, %v277_v44  ;;  %v305_v54 = vmul.f32 %v667_v28, %v285_v45  ;;  %v186_v56 = vadd.f32 %v185_v42, %v663_v20  ;;  %v218_v61 = vadd.f32 %v217_v43, %v663_v20 }
  0xfe   :  { %v280_v55 = vsel %vm248_vm4, %v194_v40, %v264_v48  ;;  %v198_v57 = vpop.f32.mrb[5].mxu0  ;;  %v230_v58 = vpop.f32.mrb[5].mxu1  ;;  %v288_v60 = vsel %vm256_vm5, %v226_v41, %v272_v50  ;;  %v207_v62 = vadd.f32 %v550_v51, %v663_v20  ;;  %v319_v1 = vadd.f32 %v674_v47, %v299_v46 }
  0xff   :  { %v300_v59 = vmul.f32 %v667_v28, %v280_v55  ;;  %v551_v63 = vpop.f32.mrb[6].mxu0  ;;  %v559_v0 = vpop.f32.mrb[6].mxu1  ;;  %v308_v2 = vmul.f32 %v667_v28, %v288_v60  ;;  %vm246_vm6 = vcmp.gt.f32.partialorder %v186_v56, 0.0  ;;  %v262_v3 = vmul.f32 0.2, %v186_v56 }
 0x100   :  { %v201_v4 = vpop.f32.mrb[7].mxu0  ;;  %v233_v5 = vpop.f32.mrb[7].mxu1  ;;  %vm254_vm7 = vcmp.gt.f32.partialorder %v218_v61, 0.0  ;;  %v270_v7 = vmul.f32 0.2, %v218_v61  ;;  %v239_v8 = vadd.f32 %v558_v52, %v663_v20  ;;  %v327_v9 = vadd.f32 %v674_v47, %v307_v49 }
 0x101   :  { %v320_v6 = vadd.f32 %v674_v47, %v300_v59  ;;  %v328_v10 = vadd.f32 %v674_v47, %v308_v2  ;;  %v278_v11 = vsel %vm246_vm6, %v186_v56, %v262_v3  ;;  %v267_v12 = vmul.f32 0.2, %v207_v62 }
 0x102   :  { %v298_v14 = vmul.f32 %v667_v28, %v278_v11  ;;  %v286_v15 = vsel %vm254_vm7, %v218_v61, %v270_v7  ;;  %vm251_vm8 = vcmp.gt.f32.partialorder %v207_v62, 0.0  ;;  %v317_v16 = vadd.f32 %v674_v47, %v297_v53 }
 0x103   :  { %v473_v13 = vpack.c.bf16 %v320_v6, %v319_v1  ;;  %v493_v17 = vpack.c.bf16 %v328_v10, %v327_v9  ;;  %v306_v18 = vmul.f32 %v667_v28, %v286_v15  ;;  %v199_v19 = vadd.f32 %v198_v57, %v663_v20 }
 0x104   :  { %v325_v21 = vadd.f32 %v674_v47, %v305_v54  ;;  %v318_v22 = vadd.f32 %v674_v47, %v298_v14  ;;  %v275_v23 = vmul.f32 0.2, %v239_v8  ;;  %v231_v24 = vadd.f32 %v230_v58, %v663_v20 }
 0x105   :  { %505 = vst [vmem:[%s744_s3 + $0x8] sm:$0xff] %v473_v13   ;;  %509 = vst [vmem:[%s744_s3 + $0x28] sm:$0xff] %v493_v17   ;;  %v326_v25 = vadd.f32 %v674_v47, %v306_v18  ;;  %v283_v26 = vsel %vm251_vm8, %v207_v62, %v267_v12  ;;  %vm259_vm9 = vcmp.gt.f32.partialorder %v239_v8, 0.0  ;;  %v265_v27 = vmul.f32 0.2, %v199_v19 }
 0x106   :  { %v468_v29 = vpack.c.bf16 %v318_v22, %v317_v16  ;;  %vm249_vm10 = vcmp.gt.f32.partialorder %v199_v19, 0.0  ;;  %v273_v30 = vmul.f32 0.2, %v231_v24  ;;  %vm257_vm11 = vcmp.gt.f32.partialorder %v231_v24, 0.0 }
 0x107   :  { %v488_v31 = vpack.c.bf16 %v326_v25, %v325_v21  ;;  %v210_v32 = vadd.f32 %v551_v63, %v663_v20  ;;  %v303_v33 = vmul.f32 %v667_v28, %v283_v26  ;;  %v291_v34 = vsel %vm259_vm9, %v239_v8, %v275_v23 }
 0x108   :  { %469 = vst [vmem:[%s744_s3] sm:$0xff] %v468_v29   ;;  %v242_v35 = vadd.f32 %v559_v0, %v663_v20  ;;  %v202_v36 = vadd.f32 %v201_v4, %v663_v20  ;;  %v281_v37 = vsel %vm249_vm10, %v199_v19, %v265_v27  ;;  %v234_v39 = vadd.f32 %v233_v5, %v663_v20 }
 0x109   :  { %508 = vst [vmem:[%s744_s3 + $0x20] sm:$0xff] %v488_v31   ;;  %vm252_vm12 = vcmp.gt.f32.partialorder %v210_v32, 0.0  ;;  %v268_v38 = vmul.f32 0.2, %v210_v32  ;;  %v289_v40 = vsel %vm257_vm11, %v231_v24, %v273_v30  ;;  %v311_v42 = vmul.f32 %v667_v28, %v291_v34 }
 0x10a   :  { %vm260_vm13 = vcmp.gt.f32.partialorder %v242_v35, 0.0  ;;  %v276_v41 = vmul.f32 0.2, %v242_v35  ;;  %vm250_vm14 = vcmp.gt.f32.partialorder %v202_v36, 0.0  ;;  %v266_v44 = vmul.f32 0.2, %v202_v36 }
 0x10b   :  { %v284_v43 = vsel %vm252_vm12, %v210_v32, %v268_v38  ;;  %vm258_vm15 = vcmp.gt.f32.partialorder %v234_v39, 0.0  ;;  %v301_v45 = vmul.f32 %v667_v28, %v281_v37  ;;  %v274_v49 = vmul.f32 0.2, %v234_v39 }
 0x10c   :  { %v304_v46 = vmul.f32 %v667_v28, %v284_v43  ;;  %v292_v48 = vsel %vm260_vm13, %v242_v35, %v276_v41  ;;  %v309_v50 = vmul.f32 %v667_v28, %v289_v40  ;;  %v282_v20 = vsel %vm250_vm14, %v202_v36, %v266_v44 }
 0x10d   :  { %v312_v51 = vmul.f32 %v667_v28, %v292_v48  ;;  %v323_v52 = vadd.f32 %v674_v47, %v303_v33  ;;  %v302_v54 = vmul.f32 %v667_v28, %v282_v20  ;;  %v290_v55 = vsel %vm258_vm15, %v234_v39, %v274_v49 }
 0x10e   :  { %v324_v53 = vadd.f32 %v674_v47, %v304_v46  ;;  %v331_v56 = vadd.f32 %v674_v47, %v311_v42  ;;  %v310_v58 = vmul.f32 %v667_v28, %v290_v55  ;;  %v321_v59 = vadd.f32 %v674_v47, %v301_v45 }
 0x10f   :  { %v332_v57 = vadd.f32 %v674_v47, %v312_v51  ;;  %v322_v61 = vadd.f32 %v674_v47, %v302_v54  ;;  %v329_v62 = vadd.f32 %v674_v47, %v309_v50 }
 0x110   :  { %v483_v60 = vpack.c.bf16 %v324_v53, %v323_v52  ;;  %v330_v0 = vadd.f32 %v674_v47, %v310_v58 }
 0x111   :  { %v503_v63 = vpack.c.bf16 %v332_v57, %v331_v56  ;;  %v478_v1 = vpack.c.bf16 %v322_v61, %v321_v59 }
 0x112   :  { %507 = vst [vmem:[%s744_s3 + $0x18] sm:$0xff] %v483_v60   ;;  %v498_v28 = vpack.c.bf16 %v330_v0, %v329_v62 }
 0x113   :  { %511 = vst [vmem:[%s744_s3 + $0x38] sm:$0xff] %v503_v63   ;;  %506 = vst [vmem:[%s744_s3 + $0x10] sm:$0xff] %v478_v1  }
 0x114   :  { %510 = vst [vmem:[%s744_s3 + $0x30] sm:$0xff] %v498_v28  }

// kernel: discriminator_forward.5
= control target key start
LH: loop header
LB: loop body
LE: loop exit
PB: predicated region body
PF: predicated region fallthrough
CT: control target
= control target key end

     0   :  { %v52_v20 = vlaneseq  ;;  %s467_s1 = inlined_call_operand.vmem [shape: bf16[256,128], index: 1, kind: input, shape index: {}]   ;;  %s468_s0 = inlined_call_operand.vmem [shape: bf16[32,256], index: 0, kind: input, shape index: {}]   ;;  %s469_s2 = inlined_call_operand.vmem [shape: f32[3,128], index: 2, kind: input, shape index: {}]   ;;  %s470_s3 = inlined_call_operand.vmem [shape: bf16[32,128], index: 3, kind: output, shape index: {}]  }
   0x1   :  { %v356_v0 = vld [vmem:[%s467_s1 + $0x40] sm:$0xff]   ;;  %v358_v2 = vld [vmem:[%s467_s1 + $0x48] sm:$0xff]   ;;  %v360_v4 = vld [vmem:[%s467_s1 + $0x50] sm:$0xff]  }
   0x2   :  { %v357_v1 = vld [vmem:[%s467_s1] sm:$0xff]   ;;  %312 = vmatprep.subr.bf16.mxu0 %v356_v0  ;;  %340 = vmatprep.subr.bf16.mxu1 %v356_v0  ;;  %v359_v3 = vld [vmem:[%s467_s1 + $0x8] sm:$0xff]   ;;  %v361_v5 = vld [vmem:[%s467_s1 + $0x10] sm:$0xff]   ;;  %v53_v21 = vshrl.u32 %v52_v20, 7 }
   0x3   :  { %313 = vmatpush3.bf16.msra.mxu0 %v357_v1  ;;  %348 = vmatpush3.bf16.msra.mxu1 %v357_v1  ;;  %v362_v6 = vld [vmem:[%s467_s1 + $0x58] sm:$0xff]   ;;  %v364_v8 = vld [vmem:[%s467_s1 + $0x60] sm:$0xff]   ;;  %v366_v10 = vld [vmem:[%s467_s1 + $0x68] sm:$0xff]  }
   0x4   :  { %314 = vmatprep.subr.bf16.mxu0 %v358_v2  ;;  %341 = vmatprep.subr.bf16.mxu1 %v358_v2  ;;  %v363_v7 = vld [vmem:[%s467_s1 + $0x18] sm:$0xff]   ;;  %v365_v9 = vld [vmem:[%s467_s1 + $0x20] sm:$0xff]   ;;  %v367_v13 = vld [vmem:[%s467_s1 + $0x28] sm:$0xff]   ;;  %v54_v22 = vsub.s32 0, %v53_v21  ;;  %v235_v28 = vsub.s32 1, %v53_v21  ;;  %v243_v41 = vsub.s32 2, %v53_v21 }
   0x5   :  { %v374_v11 = vld [vmem:[%s468_s0 + $0x4] ss:$8 sps:$4 sm:$0xff]   ;;  %v377_v12 = vld [vmem:[%s468_s0 + $0x14] ss:$8 sps:$4 sm:$0xff]   ;;  %v372_v18 = vld [vmem:[%s468_s0] ss:$8 sps:$4 sm:$0xff]  }
   0x6   :  { %v368_v14 = vld [vmem:[%s467_s1 + $0x70] sm:$0xff]   ;;  %204 = vmatprep.mubr.bf16.mxu0 %v374_v11  ;;  %212 = vmatprep.mubr.bf16.mxu1 %v377_v12  ;;  %v370_v16 = vld [vmem:[%s467_s1 + $0x78] sm:$0xff]   ;;  %v51_v23 = vld [vmem:[%s469_s2] sm:$0x7] }
   0x7   :  { %315 = vmatpush3.bf16.msra.mxu0 %v359_v3  ;;  %349 = vmatpush3.bf16.msra.mxu1 %v359_v3  ;;  %v369_v15 = vld [vmem:[%s467_s1 + $0x30] sm:$0xff]   ;;  %v371_v17 = vld [vmem:[%s467_s1 + $0x38] sm:$0xff]   ;;  %v55_v26 = vrot.slane %v51_v23, %v54_v22  ;;  %v236_v40 = vrot.slane %v51_v23, %v235_v28  ;;  %v244_v50 = vrot.slane %v51_v23, %v243_v41 }
   0x8   :  { %316 = vmatprep.subr.bf16.mxu0 %v360_v4  ;;  %342 = vmatprep.subr.bf16.mxu1 %v360_v4  ;;  %v375_v19 = vld [vmem:[%s468_s0 + $0x10] ss:$8 sps:$4 sm:$0xff]  }
   0xb   :  { %317 = vmatpush3.bf16.msra.mxu0 %v361_v5  ;;  %350 = vmatpush3.bf16.msra.mxu1 %v361_v5 }
   0xc   :  { %318 = vmatprep.subr.bf16.mxu0 %v362_v6  ;;  %343 = vmatprep.subr.bf16.mxu1 %v362_v6 }
   0xf   :  { %319 = vmatpush3.bf16.msra.mxu0 %v363_v7  ;;  %351 = vmatpush3.bf16.msra.mxu1 %v363_v7 }
  0x10   :  { %320 = vmatprep.subr.bf16.mxu0 %v364_v8  ;;  %344 = vmatprep.subr.bf16.mxu1 %v364_v8 }
  0x13   :  { %321 = vmatpush3.bf16.msra.mxu0 %v365_v9  ;;  %352 = vmatpush3.bf16.msra.mxu1 %v365_v9 }
  0x14   :  { %322 = vmatprep.subr.bf16.mxu0 %v366_v10  ;;  %345 = vmatprep.subr.bf16.mxu1 %v366_v10 }
  0x17   :  { %323 = vmatpush3.bf16.msra.mxu0 %v367_v13  ;;  %353 = vmatpush3.bf16.msra.mxu1 %v367_v13 }
  0x18   :  { %324 = vmatprep.subr.bf16.mxu0 %v368_v14  ;;  %346 = vmatprep.subr.bf16.mxu1 %v368_v14 }
  0x1b   :  { %325 = vmatpush3.bf16.msra.mxu0 %v369_v15  ;;  %354 = vmatpush3.bf16.msra.mxu1 %v369_v15 }
  0x1c   :  { %326 = vmatprep.subr.bf16.mxu0 %v370_v16  ;;  %347 = vmatprep.subr.bf16.mxu1 %v370_v16 }
  0x1f   :  { %327 = vmatpush3.bf16.msra.mxu0 %v371_v17  ;;  %355 = vmatpush3.bf16.msra.mxu1 %v371_v17 }
  0x22   :  { %205 = vmatmul.mubr.bf16.vlgmr.msra.gmra.mrb[0].mxu0 %v372_v18  ;;  %213 = vmatmul.mubr.bf16.vlgmr.msra.gmra.mrb[0].mxu1 %v375_v19 }
  0xf5   :  { %v328_v24 = vpop.f32.mrb[0].mxu0  ;;  %v334_v25 = vpop.f32.mrb[0].mxu1 }
  0xf6   :  { %v329_v27 = vpop.f32.mrb[1].mxu0  ;;  %v335_v29 = vpop.f32.mrb[1].mxu1 }
  0xf7   :  { %v330_v30 = vadd.f32 %v329_v27, %v328_v24  ;;  %v336_v31 = vadd.f32 %v335_v29, %v334_v25  ;;  %v331_v32 = vpop.f32.mrb[2].mxu0  ;;  %v337_v33 = vpop.f32.mrb[2].mxu1 }
  0xf8   :  { %v332_v34 = vpop.f32.mrb[3].mxu0  ;;  %v338_v35 = vpop.f32.mrb[3].mxu1 }
  0xf9   :  { %v207_v36 = vadd.f32 %v330_v30, %v55_v26  ;;  %v215_v37 = vadd.f32 %v336_v31, %v55_v26  ;;  %v333_v38 = vadd.f32 %v332_v34, %v331_v32  ;;  %v339_v39 = vadd.f32 %v338_v35, %v337_v33 }
  0xfb   :  { %vm221_vm0 = vcmp.gt.f32.partialorder %v207_v36, 0.0  ;;  %v225_v42 = vmul.f32 0.2, %v207_v36  ;;  %vm223_vm1 = vcmp.gt.f32.partialorder %v215_v37, 0.0  ;;  %v227_v43 = vmul.f32 0.2, %v215_v37 }
  0xfc   :  { %v210_v44 = vadd.f32 %v333_v38, %v55_v26  ;;  %v218_v45 = vadd.f32 %v339_v39, %v55_v26 }
  0xfd   :  { %v229_v46 = vsel %vm221_vm0, %v207_v36, %v225_v42  ;;  %v231_v47 = vsel %vm223_vm1, %v215_v37, %v227_v43 }
  0xfe   :  { %vm222_vm2 = vcmp.gt.f32.partialorder %v210_v44, 0.0  ;;  %v226_v48 = vmul.f32 0.2, %v210_v44  ;;  %v237_v49 = vmul.f32 %v236_v40, %v229_v46  ;;  %vm224_vm3 = vcmp.gt.f32.partialorder %v218_v45, 0.0 }
  0xff   :  { %v228_v51 = vmul.f32 0.2, %v218_v45  ;;  %v239_v52 = vmul.f32 %v236_v40, %v231_v47 }
 0x100   :  { %v230_v53 = vsel %vm222_vm2, %v210_v44, %v226_v48  ;;  %v245_v57 = vadd.f32 %v244_v50, %v237_v49 }
 0x101   :  { %v238_v54 = vmul.f32 %v236_v40, %v230_v53  ;;  %v232_v55 = vsel %vm224_vm3, %v218_v45, %v228_v51  ;;  %v247_v59 = vadd.f32 %v244_v50, %v239_v52 }
 0x102   :  { %v240_v56 = vmul.f32 %v236_v40, %v232_v55 }
 0x103   :  { %v246_v58 = vadd.f32 %v244_v50, %v238_v54 }
 0x104   :  { %v248_v60 = vadd.f32 %v244_v50, %v240_v56 }
 0x105   :  { %v304_v61 = vpack.c.bf16 %v246_v58, %v245_v57 }
 0x106   :  { %v309_v62 = vpack.c.bf16 %v248_v60, %v247_v59 }
 0x107   :  { %305 = vst [vmem:[%s470_s3] sm:$0xff] %v304_v61  }
 0x108   :  { %311 = vst [vmem:[%s470_s3 + $0x8] sm:$0xff] %v309_v62  }

// kernel: discriminator_forward.6
= control target key start
LH: loop header
LB: loop body
LE: loop exit
PB: predicated region body
PF: predicated region fallthrough
CT: control target
= control target key end

     0   :  { %v463_v1 = vmov 0.0   ;;  %vm464_vm0 = vmmov 0   ;;  %v68_v28 = vlaneseq  ;;  %s572_s1 = inlined_call_operand.vmem [shape: bf16[384,128], index: 1, kind: input, shape index: {}]   ;;  %s573_s0 = inlined_call_operand.vmem [shape: bf16[16,384], index: 0, kind: input, shape index: {}]   ;;  %s574_s2 = inlined_call_operand.vmem [shape: f32[3,128], index: 2, kind: input, shape index: {}]   ;;  %s575_s3 = inlined_call_operand.vmem [shape: bf16[16,128], index: 3, kind: output, shape index: {}]  }
   0x1   :  { %v435_v0 = vld [vmem:[%s572_s1 + $0x40] sm:$0xff]   ;;  %413 = vmatprep.subr.bf16.mxu1 %v463_v1  ;;  %429 = vmatprep.mubr.msk.bf16.mxu1 %vm464_vm0, %v463_v1  ;;  %v438_v4 = vld [vmem:[%s572_s1 + $0x48] sm:$0xff]   ;;  %v441_v7 = vld [vmem:[%s572_s1 + $0x50] sm:$0xff]  }
   0x2   :  { %v436_v2 = vld [vmem:[%s572_s1] sm:$0xff]   ;;  %382 = vmatprep.subr.bf16.mxu0 %v435_v0  ;;  %v439_v5 = vld [vmem:[%s572_s1 + $0x8] sm:$0xff]   ;;  %v442_v8 = vld [vmem:[%s572_s1 + $0x10] sm:$0xff]   ;;  %v69_v29 = vshrl.u32 %v68_v28, 7 }
   0x3   :  { %v437_v3 = vld [vmem:[%s572_s1 + $0x80] sm:$0xff]   ;;  %383 = vmatpush3.bf16.msra.mxu0 %v436_v2  ;;  %v440_v6 = vld [vmem:[%s572_s1 + $0x88] sm:$0xff]   ;;  %v443_v9 = vld [vmem:[%s572_s1 + $0x90] sm:$0xff]  }
   0x4   :  { %414 = vmatpush3.bf16.msra.mxu1 %v437_v3  ;;  %384 = vmatprep.subr.bf16.mxu0 %v438_v4  ;;  %v444_v10 = vld [vmem:[%s572_s1 + $0x58] sm:$0xff]   ;;  %v447_v13 = vld [vmem:[%s572_s1 + $0x60] sm:$0xff]   ;;  %v450_v16 = vld [vmem:[%s572_s1 + $0x68] sm:$0xff]   ;;  %v70_v30 = vsub.s32 0, %v69_v29  ;;  %v322_v39 = vsub.s32 1, %v69_v29  ;;  %v328_v48 = vsub.s32 2, %v69_v29 }
   0x5   :  { %415 = vmatprep.subr.bf16.mxu1 %v463_v1  ;;  %v445_v11 = vld [vmem:[%s572_s1 + $0x18] sm:$0xff]   ;;  %v448_v14 = vld [vmem:[%s572_s1 + $0x20] sm:$0xff]   ;;  %v451_v17 = vld [vmem:[%s572_s1 + $0x28] sm:$0xff]  }
   0x6   :  { %v446_v12 = vld [vmem:[%s572_s1 + $0x98] sm:$0xff]   ;;  %v449_v15 = vld [vmem:[%s572_s1 + $0xa0] sm:$0xff]   ;;  %v452_v18 = vld [vmem:[%s572_s1 + $0xa8] sm:$0xff]  }
   0x7   :  { %385 = vmatpush3.bf16.msra.mxu0 %v439_v5  ;;  %v453_v19 = vld [vmem:[%s572_s1 + $0x70] sm:$0xff]   ;;  %v456_v22 = vld [vmem:[%s572_s1 + $0x78] sm:$0xff]   ;;  %v458_v26 = vld [vmem:[%s573_s0] ss:$12 sps:$4 sm:$0xff]  }
   0x8   :  { %416 = vmatpush3.bf16.msra.mxu1 %v440_v6  ;;  %386 = vmatprep.subr.bf16.mxu0 %v441_v7  ;;  %v454_v20 = vld [vmem:[%s572_s1 + $0x30] sm:$0xff]   ;;  %v457_v24 = vld [vmem:[%s572_s1 + $0x38] sm:$0xff]   ;;  %v67_v31 = vld [vmem:[%s574_s2] sm:$0x7] }
   0x9   :  { %417 = vmatprep.subr.bf16.mxu1 %v463_v1  ;;  %v455_v21 = vld [vmem:[%s572_s1 + $0xb0] sm:$0xff]   ;;  %v461_v25 = vld [vmem:[%s572_s1 + $0xb8] sm:$0xff]   ;;  %v71_v33 = vrot.slane %v67_v31, %v70_v30  ;;  %v323_v47 = vrot.slane %v67_v31, %v322_v39  ;;  %v329_v54 = vrot.slane %v67_v31, %v328_v48 }
   0xa   :  { %v460_v23 = vld [vmem:[%s573_s0 + $0x4] ss:$12 sps:$4 sm:$0xff]   ;;  %v462_v27 = vld [vmem:[%s573_s0 + $0x8] ss:$12 sps:$4 sm:$0xff]  }
   0xb   :  { %387 = vmatpush3.bf16.msra.mxu0 %v442_v8  ;;  %264 = vmatprep.mubr.bf16.mxu0 %v460_v23 }
   0xc   :  { %418 = vmatpush3.bf16.msra.mxu1 %v443_v9  ;;  %388 = vmatprep.subr.bf16.mxu0 %v444_v10 }
   0xd   :  { %419 = vmatprep.subr.bf16.mxu1 %v463_v1 }
   0xf   :  { %389 = vmatpush3.bf16.msra.mxu0 %v445_v11 }
  0x10   :  { %420 = vmatpush3.bf16.msra.mxu1 %v446_v12  ;;  %390 = vmatprep.subr.bf16.mxu0 %v447_v13 }
  0x11   :  { %421 = vmatprep.subr.bf16.mxu1 %v463_v1 }
  0x13   :  { %391 = vmatpush3.bf16.msra.mxu0 %v448_v14 }
  0x14   :  { %422 = vmatpush3.bf16.msra.mxu1 %v449_v15  ;;  %392 = vmatprep.subr.bf16.mxu0 %v450_v16 }
  0x15   :  { %423 = vmatprep.subr.bf16.mxu1 %v463_v1 }
  0x17   :  { %393 = vmatpush3.bf16.msra.mxu0 %v451_v17 }
  0x18   :  { %424 = vmatpush3.bf16.msra.mxu1 %v452_v18  ;;  %394 = vmatprep.subr.bf16.mxu0 %v453_v19 }
  0x19   :  { %425 = vmatprep.subr.bf16.mxu1 %v463_v1 }
  0x1b   :  { %395 = vmatpush3.bf16.msra.mxu0 %v454_v20 }
  0x1c   :  { %426 = vmatpush3.bf16.msra.mxu1 %v455_v21  ;;  %396 = vmatprep.subr.bf16.mxu0 %v456_v22 }
  0x1d   :  { %427 = vmatprep.subr.bf16.mxu1 %v463_v1 }
  0x1f   :  { %397 = vmatpush3.bf16.msra.mxu0 %v457_v24 }
  0x20   :  { %428 = vmatpush3.bf16.msra.mxu1 %v461_v25 }
  0x22   :  { %265 = vmatmul.mubr.bf16.vlgmr.msra.gmra.mrb[0].mxu0 %v458_v26 }
  0x23   :  { %430 = vmatmul.mubr.bf16.vlgmr.msra.gmra.mrb[0].mxu1 %v462_v27 }
  0xf5   :  { %v398_v32 = vpop.f32.mrb[0].mxu0 }
  0xf6   :  { %v399_v34 = vpop.f32.mrb[1].mxu0  ;;  %v307_v35 = vpop.f32.mrb[0].mxu1 }
  0xf7   :  { %v400_v36 = vadd.f32 %v399_v34, %v398_v32  ;;  %v401_v37 = vpop.f32.mrb[2].mxu0  ;;  %v431_v38 = vpop.f32.mrb[1].mxu1 }
  0xf8   :  { %v402_v40 = vpop.f32.mrb[3].mxu0  ;;  %v310_v41 = vpop.f32.mrb[2].mxu1 }
  0xf9   :  { %v267_v42 = vadd.f32 %v400_v36, %v71_v33  ;;  %v403_v43 = vadd.f32 %v402_v40, %v401_v37  ;;  %v432_v44 = vpop.f32.mrb[3].mxu1 }
  0xfb   :  { %v308_v45 = vadd.f32 %v307_v35, %v267_v42  ;;  %v270_v46 = vadd.f32 %v403_v43, %v71_v33 }
  0xfd   :  { %vm314_vm1 = vcmp.gt.f32.partialorder %v308_v45, 0.0  ;;  %v316_v49 = vmul.f32 0.2, %v308_v45  ;;  %v311_v50 = vadd.f32 %v310_v41, %v270_v46 }
  0xff   :  { %v318_v51 = vsel %vm314_vm1, %v308_v45, %v316_v49  ;;  %vm315_vm2 = vcmp.gt.f32.partialorder %v311_v50, 0.0  ;;  %v317_v52 = vmul.f32 0.2, %v311_v50 }
 0x100   :  { %v324_v53 = vmul.f32 %v323_v47, %v318_v51 }
 0x101   :  { %v319_v55 = vsel %vm315_vm2, %v311_v50, %v317_v52 }
 0x102   :  { %v325_v56 = vmul.f32 %v323_v47, %v319_v55  ;;  %v330_v57 = vadd.f32 %v329_v54, %v324_v53 }
 0x104   :  { %v331_v58 = vadd.f32 %v329_v54, %v325_v56 }
 0x106   :  { %v380_v59 = vpack.c.bf16 %v331_v58, %v330_v57 }
 0x108   :  { %381 = vst [vmem:[%s575_s3] sm:$0xff] %v380_v59  }

// kernel: discriminator_forward.7
= control target key start
LH: loop header
LB: loop body
LE: loop exit
PB: predicated region body
PF: predicated region fallthrough
CT: control target
= control target key end

     0   :  { %v915_v33 = vmov 0.0   ;;  %vm916_vm0 = vmmov 0   ;;  %v108_v54 = vlaneseq  ;;  %s1130_s1 = inlined_call_operand.vmem [shape: bf16[640,128], index: 1, kind: input, shape index: {}]   ;;  %s1131_s0 = inlined_call_operand.vmem [shape: bf16[16,640], index: 0, kind: input, shape index: {}]   ;;  %s1132_s3 = inlined_call_operand.vmem [shape: bf16[128,128], index: 3, kind: input, shape index: {}]   ;;  %s1133_s2 = inlined_call_operand.vmem [shape: f32[3,128], index: 2, kind: input, shape index: {}]   ;;  %s1134_s4 = inlined_call_operand.vmem [shape: f32[1,128], index: 4, kind: input, shape index: {}]   ;;  %s1135_s5 = inlined_call_operand.vmem [shape: f32[16,128], index: 5, kind: output, shape index: {}]  }
   0x1   :  { %v844_v0 = vld [vmem:[%s1130_s1 + $0x40] sm:$0xff]   ;;  %v848_v4 = vld [vmem:[%s1130_s1 + $0x48] sm:$0xff]   ;;  %v852_v8 = vld [vmem:[%s1130_s1 + $0x50] sm:$0xff]  }
   0x2   :  { %v845_v1 = vld [vmem:[%s1130_s1] sm:$0xff]   ;;  %740 = vmatprep.subr.bf16.mxu0 %v844_v0  ;;  %v849_v5 = vld [vmem:[%s1130_s1 + $0x8] sm:$0xff]   ;;  %v853_v9 = vld [vmem:[%s1130_s1 + $0x10] sm:$0xff]   ;;  %v109_v55 = vshrl.u32 %v108_v54, 7 }
   0x3   :  { %v846_v2 = vld [vmem:[%s1130_s1 + $0xc0] sm:$0xff]   ;;  %741 = vmatpush3.bf16.msra.mxu0 %v845_v1  ;;  %v850_v6 = vld [vmem:[%s1130_s1 + $0xc8] sm:$0xff]   ;;  %v854_v10 = vld [vmem:[%s1130_s1 + $0xd0] sm:$0xff]  }
   0x4   :  { %v847_v3 = vld [vmem:[%s1130_s1 + $0x80] sm:$0xff]   ;;  %762 = vmatprep.subr.bf16.mxu1 %v846_v2  ;;  %742 = vmatprep.subr.bf16.mxu0 %v848_v4  ;;  %v851_v7 = vld [vmem:[%s1130_s1 + $0x88] sm:$0xff]   ;;  %v855_v11 = vld [vmem:[%s1130_s1 + $0x90] sm:$0xff]   ;;  %v110_v56 = vsub.s32 0, %v109_v55 }
   0x5   :  { %763 = vmatpush3.bf16.msra.mxu1 %v847_v3  ;;  %v856_v12 = vld [vmem:[%s1130_s1 + $0x58] sm:$0xff]   ;;  %v860_v16 = vld [vmem:[%s1130_s1 + $0x60] sm:$0xff]   ;;  %v864_v20 = vld [vmem:[%s1130_s1 + $0x68] sm:$0xff]  }
   0x6   :  { %764 = vmatprep.subr.bf16.mxu1 %v850_v6  ;;  %v857_v13 = vld [vmem:[%s1130_s1 + $0x18] sm:$0xff]   ;;  %v861_v17 = vld [vmem:[%s1130_s1 + $0x20] sm:$0xff]   ;;  %v865_v21 = vld [vmem:[%s1130_s1 + $0x28] sm:$0xff]  }
   0x7   :  { %743 = vmatpush3.bf16.msra.mxu0 %v849_v5  ;;  %v858_v14 = vld [vmem:[%s1130_s1 + $0xd8] sm:$0xff]   ;;  %v862_v18 = vld [vmem:[%s1130_s1 + $0xe0] sm:$0xff]   ;;  %v866_v22 = vld [vmem:[%s1130_s1 + $0xe8] sm:$0xff]  }
   0x8   :  { %744 = vmatprep.subr.bf16.mxu0 %v852_v8  ;;  %v859_v15 = vld [vmem:[%s1130_s1 + $0x98] sm:$0xff]   ;;  %v863_v19 = vld [vmem:[%s1130_s1 + $0xa0] sm:$0xff]   ;;  %v867_v23 = vld [vmem:[%s1130_s1 + $0xa8] sm:$0xff]  }
   0x9   :  { %765 = vmatpush3.bf16.msra.mxu1 %v851_v7  ;;  %v868_v24 = vld [vmem:[%s1130_s1 + $0x70] sm:$0xff]   ;;  %v872_v28 = vld [vmem:[%s1130_s1 + $0x78] sm:$0xff]   ;;  %v881_v36 = vld [vmem:[%s1131_s0 + $0xc] ss:$20 sps:$4 sm:$0xff]  }
   0xa   :  { %766 = vmatprep.subr.bf16.mxu1 %v854_v10  ;;  %v869_v25 = vld [vmem:[%s1130_s1 + $0x30] sm:$0xff]   ;;  %v873_v29 = vld [vmem:[%s1130_s1 + $0x38] sm:$0xff]   ;;  %v882_v37 = vld [vmem:[%s1130_s1 + $0x100] sm:$0xff]   ;;  %451 = vmatprep.mubr.bf16.mxu1 %v881_v36 }
   0xb   :  { %745 = vmatpush3.bf16.msra.mxu0 %v853_v9  ;;  %v870_v26 = vld [vmem:[%s1130_s1 + $0xf0] sm:$0xff]   ;;  %v874_v30 = vld [vmem:[%s1130_s1 + $0xf8] sm:$0xff]   ;;  %v883_v38 = vld [vmem:[%s1130_s1 + $0x108] sm:$0xff]  }
   0xc   :  { %746 = vmatprep.subr.bf16.mxu0 %v856_v12  ;;  %v871_v27 = vld [vmem:[%s1130_s1 + $0xb0] sm:$0xff]   ;;  %v877_v32 = vld [vmem:[%s1131_s0 + $0x4] ss:$20 sps:$4 sm:$0xff]   ;;  %v879_v35 = vld [vmem:[%s1131_s0 + $0x8] ss:$20 sps:$4 sm:$0xff]  }
   0xd   :  { %767 = vmatpush3.bf16.msra.mxu1 %v855_v11  ;;  %v875_v31 = vld [vmem:[%s1131_s0] ss:$20 sps:$4 sm:$0xff]   ;;  %v878_v34 = vld [vmem:[%s1130_s1 + $0xb8] sm:$0xff]   ;;  %410 = vmatprep.mubr.bf16.mxu0 %v877_v32  ;;  %v887_v42 = vld [vmem:[%s1130_s1 + $0x128] sm:$0xff]   ;;  %v509_v11 = vsub.s32 1, %v109_v55 }
   0xe   :  { %768 = vmatprep.subr.bf16.mxu1 %v858_v14  ;;  %v884_v39 = vld [vmem:[%s1130_s1 + $0x110] sm:$0xff]   ;;  %v885_v40 = vld [vmem:[%s1130_s1 + $0x118] sm:$0xff]   ;;  %v886_v41 = vld [vmem:[%s1130_s1 + $0x120] sm:$0xff]  }
   0xf   :  { %747 = vmatpush3.bf16.msra.mxu0 %v857_v13  ;;  %v888_v43 = vld [vmem:[%s1130_s1 + $0x130] sm:$0xff]   ;;  %v889_v44 = vld [vmem:[%s1130_s1 + $0x138] sm:$0xff]   ;;  %v891_v46 = vld [vmem:[%s1132_s3] sm:$0xff]  }
  0x10   :  { %748 = vmatprep.subr.bf16.mxu0 %v860_v16  ;;  %v890_v45 = vld [vmem:[%s1131_s0 + $0x10] ss:$20 sps:$4 sm:$0xff]   ;;  %v892_v47 = vld [vmem:[%s1132_s3 + $0x8] sm:$0xff]   ;;  %v894_v49 = vld [vmem:[%s1132_s3 + $0x18] sm:$0xff]  }
  0x11   :  { %769 = vmatpush3.bf16.msra.mxu1 %v859_v15  ;;  %v893_v48 = vld [vmem:[%s1132_s3 + $0x10] sm:$0xff]   ;;  %v895_v50 = vld [vmem:[%s1132_s3 + $0x20] sm:$0xff]   ;;  %v896_v51 = vld [vmem:[%s1132_s3 + $0x28] sm:$0xff]   ;;  %v515_v15 = vsub.s32 2, %v109_v55 }
  0x12   :  { %770 = vmatprep.subr.bf16.mxu1 %v862_v18  ;;  %v897_v52 = vld [vmem:[%s1132_s3 + $0x30] sm:$0xff]   ;;  %v898_v53 = vld [vmem:[%s1132_s3 + $0x38] sm:$0xff]   ;;  %v107_v57 = vld [vmem:[%s1133_s2] sm:$0x7] }
  0x13   :  { %749 = vmatpush3.bf16.msra.mxu0 %v861_v17  ;;  %v111_v59 = vrot.slane %v107_v57, %v110_v56  ;;  %v510_v16 = vrot.slane %v107_v57, %v509_v11 }
  0x14   :  { %750 = vmatprep.subr.bf16.mxu0 %v864_v20 }
  0x15   :  { %771 = vmatpush3.bf16.msra.mxu1 %v863_v19 }
  0x16   :  { %772 = vmatprep.subr.bf16.mxu1 %v866_v22 }
  0x17   :  { %751 = vmatpush3.bf16.msra.mxu0 %v865_v21 }
  0x18   :  { %752 = vmatprep.subr.bf16.mxu0 %v868_v24 }
  0x19   :  { %773 = vmatpush3.bf16.msra.mxu1 %v867_v23  ;;  %v516_v23 = vrot.slane %v107_v57, %v515_v15 }
  0x1a   :  { %774 = vmatprep.subr.bf16.mxu1 %v870_v26 }
  0x1b   :  { %753 = vmatpush3.bf16.msra.mxu0 %v869_v25 }
  0x1c   :  { %754 = vmatprep.subr.bf16.mxu0 %v872_v28 }
  0x1d   :  { %775 = vmatpush3.bf16.msra.mxu1 %v871_v27 }
  0x1e   :  { %776 = vmatprep.subr.bf16.mxu1 %v874_v30  ;;  %v1109_v30 = vand.u32 127, %v108_v54 }
  0x1f   :  { %755 = vmatpush3.bf16.msra.mxu0 %v873_v29 }
  0x20   :  { %802 = vmatprep.subr.bf16.mxu0 %v915_v33  ;;  %vm634_vm3 = vcmp.lt.s32.totalorder %v1109_v30, 10  ;;  %vm675_vm4 = vcmp.eq.s32.totalorder %v1109_v30, 10 }
  0x21   :  { %777 = vmatpush3.bf16.msra.mxu1 %v878_v34 }
  0x22   :  { %411 = vmatmul.mubr.bf16.vlgmr.msra.gmra.mrb[0].mxu0 %v875_v31  ;;  %822 = vmatprep.subr.bf16.mxu1 %v915_v33  ;;  %v731_v31 = vld [vmem:[%s1134_s4] ss:$0 sm:$0xff] }
  0x23   :  { %818 = vmatprep.mubr.msk.bf16.mxu0 %vm916_vm0, %v915_v33  ;;  %803 = vmatpush3.bf16.msra.mxu0 %v882_v37 }
  0x24   :  { %452 = vmatmul.mubr.bf16.vlgmr.msra.gmra.mrb[0].mxu1 %v879_v35  ;;  %804 = vmatprep.subr.bf16.mxu0 %v915_v33 }
  0x25   :  { %838 = vmatprep.mubr.msk.bf16.mxu1 %vm916_vm0, %v915_v33  ;;  %823 = vmatpush3.bf16.msra.mxu1 %v891_v46 }
  0x26   :  { %824 = vmatprep.subr.bf16.mxu1 %v915_v33 }
  0x27   :  { %805 = vmatpush3.bf16.msra.mxu0 %v883_v38 }
  0x28   :  { %806 = vmatprep.subr.bf16.mxu0 %v915_v33 }
  0x29   :  { %825 = vmatpush3.bf16.msra.mxu1 %v892_v47 }
  0x2a   :  { %826 = vmatprep.subr.bf16.mxu1 %v915_v33 }
  0x2b   :  { %807 = vmatpush3.bf16.msra.mxu0 %v884_v39 }
  0x2c   :  { %808 = vmatprep.subr.bf16.mxu0 %v915_v33 }
  0x2d   :  { %827 = vmatpush3.bf16.msra.mxu1 %v893_v48 }
  0x2e   :  { %828 = vmatprep.subr.bf16.mxu1 %v915_v33 }
  0x2f   :  { %809 = vmatpush3.bf16.msra.mxu0 %v885_v40 }
  0x30   :  { %810 = vmatprep.subr.bf16.mxu0 %v915_v33 }
  0x31   :  { %829 = vmatpush3.bf16.msra.mxu1 %v894_v49 }
  0x32   :  { %830 = vmatprep.subr.bf16.mxu1 %v915_v33 }
  0x33   :  { %811 = vmatpush3.bf16.msra.mxu0 %v886_v41 }
  0x34   :  { %812 = vmatprep.subr.bf16.mxu0 %v915_v33 }
  0x35   :  { %831 = vmatpush3.bf16.msra.mxu1 %v895_v50 }
  0x36   :  { %832 = vmatprep.subr.bf16.mxu1 %v915_v33 }
  0x37   :  { %813 = vmatpush3.bf16.msra.mxu0 %v887_v42 }
  0x38   :  { %814 = vmatprep.subr.bf16.mxu0 %v915_v33 }
  0x39   :  { %833 = vmatpush3.bf16.msra.mxu1 %v896_v51 }
  0x3a   :  { %834 = vmatprep.subr.bf16.mxu1 %v915_v33 }
  0x3b   :  { %815 = vmatpush3.bf16.msra.mxu0 %v888_v43 }
  0x3c   :  { %816 = vmatprep.subr.bf16.mxu0 %v915_v33 }
  0x3d   :  { %835 = vmatpush3.bf16.msra.mxu1 %v897_v52 }
  0x3e   :  { %836 = vmatprep.subr.bf16.mxu1 %v915_v33 }
  0x3f   :  { %817 = vmatpush3.bf16.msra.mxu0 %v889_v44 }
  0x41   :  { %837 = vmatpush3.bf16.msra.mxu1 %v898_v53 }
  0x42   :  { %819 = vmatmul.mubr.bf16.vlgmr.msra.gmra.mrb[4].mxu0 %v890_v45 }
  0xf5   :  { %v756_v58 = vpop.f32.mrb[0].mxu0 }
  0xf6   :  { %v757_v60 = vpop.f32.mrb[1].mxu0 }
  0xf7   :  { %v758_v61 = vadd.f32 %v757_v60, %v756_v58  ;;  %v759_v62 = vpop.f32.mrb[2].mxu0  ;;  %v778_v63 = vpop.f32.mrb[0].mxu1 }
  0xf8   :  { %v760_v0 = vpop.f32.mrb[3].mxu0  ;;  %v779_v3 = vpop.f32.mrb[1].mxu1 }
  0xf9   :  { %v413_v1 = vadd.f32 %v758_v61, %v111_v59  ;;  %v761_v2 = vadd.f32 %v760_v0, %v759_v62  ;;  %v780_v4 = vadd.f32 %v779_v3, %v778_v63  ;;  %v781_v5 = vpop.f32.mrb[2].mxu1 }
  0xfa   :  { %v782_v7 = vpop.f32.mrb[3].mxu1 }
  0xfb   :  { %v416_v6 = vadd.f32 %v761_v2, %v111_v59  ;;  %v783_v8 = vadd.f32 %v782_v7, %v781_v5  ;;  %v454_v9 = vadd.f32 %v780_v4, %v413_v1 }
  0xfd   :  { %v457_v10 = vadd.f32 %v783_v8, %v416_v6 }
 0x115   :  { %v494_v12 = vpop.f32.mrb[4].mxu0 }
 0x116   :  { %v495_v13 = vadd.f32 %v494_v12, %v454_v9  ;;  %v820_v14 = vpop.f32.mrb[5].mxu0 }
 0x117   :  { %v497_v17 = vpop.f32.mrb[6].mxu0 }
 0x118   :  { %vm501_vm1 = vcmp.gt.f32.partialorder %v495_v13, 0.0  ;;  %v503_v18 = vmul.f32 0.2, %v495_v13  ;;  %v498_v19 = vadd.f32 %v497_v17, %v457_v10  ;;  %v821_v20 = vpop.f32.mrb[7].mxu0 }
 0x11a   :  { %v505_v21 = vsel %vm501_vm1, %v495_v13, %v503_v18  ;;  %vm502_vm2 = vcmp.gt.f32.partialorder %v498_v19, 0.0  ;;  %v504_v22 = vmul.f32 0.2, %v498_v19 }
 0x11b   :  { %v511_v24 = vmul.f32 %v510_v16, %v505_v21 }
 0x11c   :  { %v506_v25 = vsel %vm502_vm2, %v498_v19, %v504_v22 }
 0x11d   :  { %v512_v26 = vmul.f32 %v510_v16, %v506_v25  ;;  %v517_v27 = vadd.f32 %v516_v23, %v511_v24 }
 0x11f   :  { %v518_v28 = vadd.f32 %v516_v23, %v512_v26 }
 0x121   :  { %v519_v29 = vpack.c.bf16 %v518_v28, %v517_v27 }
 0x123   :  { %839 = vmatmul.mubr.bf16.vlgmr.msra.gmra.mrb[4].mxu1 %v519_v29 }
 0x1f6   :  { %v625_v32 = vpop.f32.mrb[4].mxu1 }
 0x1f7   :  { %v626_v33 = vadd.f32 %v731_v31, %v625_v32  ;;  %v840_v34 = vpop.f32.mrb[5].mxu1 }
 0x1f8   :  { %v628_v35 = vpop.f32.mrb[6].mxu1 }
 0x1f9   :  { %v655_v36 = vand.u32 2147483647, %v626_v33  ;;  %v629_v37 = vadd.f32 %v731_v31, %v628_v35  ;;  %v841_v38 = vpop.f32.mrb[7].mxu1  ;;  %v635_v39 = vsel %vm634_vm3, %v626_v33, -inf  ;;  %vm663_vm5 = vcmp.ge.f32.partialorder %v626_v33, 0.0 }
 0x1fa   :  { %637 = vmax.xlane.f32.xlu0 %v635_v39 }
 0x1fb   :  { %v657_v40 = vsub.f32 0.0, %v655_v36  ;;  %v656_v41 = vand.u32 2147483647, %v629_v37  ;;  %v636_v44 = vsel %vm634_vm3, %v629_v37, -inf  ;;  %vm664_vm6 = vcmp.ge.f32.partialorder %v629_v37, 0.0 }
 0x1fd   :  { %v659_v42 = vmul.f32 1.442695, %v657_v40  ;;  %v658_v43 = vsub.f32 0.0, %v656_v41 }
 0x1fe   :  { %639 = vmax.xlane.f32.xlu0 %v636_v44 }
 0x1ff   :  { %899 = vpow2.f32 %v659_v42  ;;  %v661_v45 = vmul.f32 1.442695, %v658_v43 }
 0x201   :  { %901 = vpow2.f32 %v661_v45 }
 0x209   :  { %v900_v46 = vpop.eup %899 }
 0x20a   :  { %v665_v47 = vadd.f32 1.0, %v900_v46 }
 0x20b   :  { %v902_v48 = vpop.eup %901 }
 0x20c   :  { %903 = vrcp.f32 %v665_v47  ;;  %v666_v49 = vadd.f32 1.0, %v902_v48 }
 0x20e   :  { %905 = vrcp.f32 %v666_v49 }
 0x216   :  { %v904_v50 = vpop.eup %903 }
 0x217   :  { %v671_v51 = vmul.f32 %v904_v50, %v900_v46 }
 0x218   :  { %v906_v52 = vpop.eup %905 }
 0x219   :  { %v673_v53 = vsel %vm663_vm5, %v904_v50, %v671_v51  ;;  %v672_v54 = vmul.f32 %v906_v52, %v902_v48 }
 0x21a   :  { %v676_v55 = vsel %vm675_vm4, %v673_v53, 0.0 }
 0x21b   :  { %v674_v56 = vsel %vm664_vm6, %v906_v52, %v672_v54 }
 0x21c   :  { %v677_v57 = vsel %vm675_vm4, %v674_v56, 0.0 }
 0x287   :  { %v638_v58 = vpop.xlane.xlu0 %637 }
 0x288   :  { %v641_v59 = vsub.f32 %v635_v39, %v638_v58 }
 0x28a   :  { %v643_v60 = vmul.f32 1.442695, %v641_v59 }
 0x28b   :  { %v640_v61 = vpop.xlane.xlu0 %639 }
 0x28c   :  { %907 = vpow2.f32 %v643_v60  ;;  %v642_v62 = vsub.f32 %v636_v44, %v640_v61 }
 0x28e   :  { %v645_v63 = vmul.f32 1.442695, %v642_v62 }
 0x290   :  { %909 = vpow2.f32 %v645_v63 }
 0x296   :  { %v908_v0 = vpop.eup %907 }
 0x297   :  { %647 = vadd.xlane.f32.xlu1 %v908_v0 }
 0x29a   :  { %v910_v1 = vpop.eup %909 }
 0x29b   :  { %649 = vadd.xlane.f32.xlu1 %v910_v1 }
 0x324   :  { %v648_v2 = vpop.xlane.xlu1 %647 }
 0x325   :  { %911 = vrcp.f32 %v648_v2 }
 0x328   :  { %v650_v3 = vpop.xlane.xlu1 %649 }
 0x329   :  { %913 = vrcp.f32 %v650_v3 }
 0x32f   :  { %v912_v4 = vpop.eup %911 }
 0x330   :  { %v653_v5 = vmul.f32 %v912_v4, %v908_v0 }
 0x332   :  { %v678_v6 = vsel %vm634_vm3, %v653_v5, %v676_v55 }
 0x333   :  { %v914_v7 = vpop.eup %913  ;;  %680 = vst [vmem:[%s1135_s5] sm:$0xff] %v678_v6 }
 0x334   :  { %v654_v8 = vmul.f32 %v914_v7, %v910_v1 }
 0x336   :  { %v679_v9 = vsel %vm634_vm3, %v654_v8, %v677_v57 }
 0x337   :  { %681 = vst [vmem:[%s1135_s5 + $0x8] sm:$0xff] %v679_v9 }

</bundles_post_ra>
